<compile_context>
chip_gen: v6e
topology: v6e:2x2x1
jax: 0.10.0
libtpu: 0.0.40
codegen_flags: <defaults>
</compile_context>

<pallas_src>
import functools

import jax
import jax.numpy as jnp
from jax.experimental import pallas as pl
from jax.experimental.pallas import tpu as pltpu

LANE = 128


def _round_up(v, m):
    return ((v + m - 1) // m) * m


def _pick_row_tile(H, target):
    """Largest divisor of H that is <= target (so row blocks tile H exactly)."""
    return max(t for t in range(1, H + 1) if H % t == 0 and t <= target)


# --------------------------------------------------------------------------
# Fused Pallas kernel
# --------------------------------------------------------------------------

def _fused_bottleneck_kernel(x_ref, w1_ref, s1_ref, b1_ref,
                             w2_ref, s2_ref, b2_ref,
                             w3_ref, s3_ref, b3_ref,
                             o_ref, s1pad_ref,
                             *, H, W, TR, RB, Cp, Pp, Cop):
    """One grid step = (batch n, row block rb) -> TR output rows.

    x_ref    : (1, H, W, Cp)        whole image, resident in VMEM per n
    w1_ref   : (Cp, Pp)             1x1 conv1 weight (in, out), lane padded
    w2_ref   : (3, 3*Pp, Pp)        3x3 conv2 weight [dy, dx*Pp+cin, cout]
    w3_ref   : (Pp, Cop)            1x1 conv3 weight
    s*_ref/b*_ref : (1, C)          folded BN scale / bias
    o_ref    : (1, TR, W, Cop)      output row block
    s1pad_ref: (H+2, W+2, Pp)       stage-1 output, zero-padded, VMEM scratch
    """
    rb = pl.program_id(1)

    # ---- stage 1: relu(x) -> conv1(1x1) -> bn1 -> relu, whole image, once --
    @pl.when(rb == 0)
    def _():
        # top / bottom zero-padding rows
        s1pad_ref[0, :, :] = jnp.zeros((W + 2, Pp), jnp.float32)
        s1pad_ref[H + 1, :, :] = jnp.zeros((W + 2, Pp), jnp.float32)
        w1 = w1_ref[...]
        sc = s1_ref[...]
        bi = b1_ref[...]
        zcol = jnp.zeros((TR, 1, Pp), jnp.float32)
        for r in range(RB):                       # static unroll, bounded temps
            xr = x_ref[0, r * TR:(r + 1) * TR, :, :]          # (TR, W, Cp)
            xr = jnp.maximum(xr.reshape(TR * W, Cp), 0.0)      # relu(x)
            a = jnp.dot(xr, w1, preferred_element_type=jnp.float32)
            a = jnp.maximum(a * sc + bi, 0.0).reshape(TR, W, Pp)
            # add left/right zero-pad columns, store full-width rows (aligned)
            row = jnp.concatenate([zcol, a, zcol], axis=1)     # (TR, W+2, Pp)
            s1pad_ref[1 + r * TR:1 + (r + 1) * TR, :, :] = row

    # ---- stage 2: conv2(3x3, pad=1) -> bn2 -> relu for this row block ------
    r0 = rb * TR
    acc = jnp.zeros((TR * W, Pp), jnp.float32)
    for dy in range(3):
        slab = s1pad_ref[pl.ds(r0 + dy, TR), :, :]             # (TR, W+2, Pp)
        win = jnp.concatenate(
            [slab[:, 0:W, :], slab[:, 1:W + 1, :], slab[:, 2:W + 2, :]],
            axis=-1).reshape(TR * W, 3 * Pp)                   # K = 3*Pp
        acc = acc + jnp.dot(win, w2_ref[dy],
                            preferred_element_type=jnp.float32)
    h = jnp.maximum(acc * s2_ref[...] + b2_ref[...], 0.0)

    # ---- stage 3: conv3(1x1) -> bn3 -> + relu(x) (residual) ----------------
    out = jnp.dot(h, w3_ref[...], preferred_element_type=jnp.float32)
    out = out * s3_ref[...] + b3_ref[...]
    res = jnp.maximum(x_ref[0, pl.ds(r0, TR), :, :], 0.0)      # (TR, W, Cp==Cop)
    out = out + res.reshape(TR * W, Cop)
    o_ref[...] = out.reshape(1, TR, W, Cop).astype(o_ref.dtype)


# --------------------------------------------------------------------------
# Wrapper
# --------------------------------------------------------------------------

def bottleneck_forward(x_nchw, params, *, row_tile=8):
    """Pallas Bottleneck forward.  x_nchw: (N, inplanes, H, W) float32."""
    w1, s1, b1, w2, s2, b2, w3, s3, b3 = params
    N, Cin, H, W = x_nchw.shape
    P = w1.shape[1]            # planes
    C4 = w3.shape[1]           # planes * 4
    assert C4 == Cin, "downsample=None requires inplanes == 4*planes"

    Cp = _round_up(Cin, LANE)
    Pp = _round_up(P, LANE)
    Cop = _round_up(C4, LANE)  # == Cp since C4 == Cin

    # NCHW -> NHWC and lane-pad channels (single fused XLA pass under jit).
    x = jnp.transpose(x_nchw, (0, 2, 3, 1)).astype(jnp.float32)
    if Cp != Cin:
        x = jnp.pad(x, ((0, 0), (0, 0), (0, 0), (0, Cp - Cin)))

    # Lane-pad parameters with zeros (keeps padded channels identically zero).
    w1p = jnp.pad(w1.astype(jnp.float32), ((0, Cp - Cin), (0, Pp - P)))
    s1p = jnp.pad(s1.astype(jnp.float32), (0, Pp - P)).reshape(1, Pp)
    b1p = jnp.pad(b1.astype(jnp.float32), (0, Pp - P)).reshape(1, Pp)
    w2p = jnp.pad(w2.astype(jnp.float32),
                  ((0, 0), (0, 0), (0, Pp - P), (0, Pp - P)))
    w2r = w2p.reshape(3, 3 * Pp, Pp)          # [dy, dx*Pp + cin, cout]
    s2p = jnp.pad(s2.astype(jnp.float32), (0, Pp - P)).reshape(1, Pp)
    b2p = jnp.pad(b2.astype(jnp.float32), (0, Pp - P)).reshape(1, Pp)
    w3p = jnp.pad(w3.astype(jnp.float32), ((0, Pp - P), (0, Cop - C4)))
    s3p = jnp.pad(s3.astype(jnp.float32), (0, Cop - C4)).reshape(1, Cop)
    b3p = jnp.pad(b3.astype(jnp.float32), (0, Cop - C4)).reshape(1, Cop)

    TR = _pick_row_tile(H, row_tile)
    RB = H // TR

    kern = functools.partial(_fused_bottleneck_kernel,
                             H=H, W=W, TR=TR, RB=RB, Cp=Cp, Pp=Pp, Cop=Cop)
    out = pl.pallas_call(
        kern,
        grid=(N, RB),
        in_specs=[
            pl.BlockSpec((1, H, W, Cp), lambda n, r: (n, 0, 0, 0)),   # x (resident)
            pl.BlockSpec((Cp, Pp), lambda n, r: (0, 0)),              # w1
            pl.BlockSpec((1, Pp), lambda n, r: (0, 0)),               # s1
            pl.BlockSpec((1, Pp), lambda n, r: (0, 0)),               # b1
            pl.BlockSpec((3, 3 * Pp, Pp), lambda n, r: (0, 0, 0)),    # w2
            pl.BlockSpec((1, Pp), lambda n, r: (0, 0)),               # s2
            pl.BlockSpec((1, Pp), lambda n, r: (0, 0)),               # b2
            pl.BlockSpec((Pp, Cop), lambda n, r: (0, 0)),             # w3
            pl.BlockSpec((1, Cop), lambda n, r: (0, 0)),              # s3
            pl.BlockSpec((1, Cop), lambda n, r: (0, 0)),              # b3
        ],
        out_specs=pl.BlockSpec((1, TR, W, Cop), lambda n, r: (n, r, 0, 0)),
        out_shape=jax.ShapeDtypeStruct((N, H, W, Cop), jnp.float32),
        scratch_shapes=[pltpu.VMEM((H + 2, W + 2, Pp), jnp.float32)],
        compiler_params=pltpu.CompilerParams(
            dimension_semantics=("parallel", "arbitrary"),
            vmem_limit_bytes=32 * 1024 * 1024),
    )(x, w1p, s1p, b1p, w2r, s2p, b2p, w3p, s3p, b3p)

    out = out[..., :C4]                               # drop lane padding
    return jnp.transpose(out, (0, 3, 1, 2))           # back to NCHW (contract)


# --------------------------------------------------------------------------
# Reference (plain JAX/XLA) for correctness check
# --------------------------------------------------------------------------

def bottleneck_reference(x_nchw, params):
    w1, s1, b1, w2, s2, b2, w3, s3, b3 = params
    x = jnp.transpose(x_nchw, (0, 2, 3, 1)).astype(jnp.float32)   # NHWC
    x = jnp.maximum(x, 0.0)
    residual = x

    def conv1x1(v, w):  # w: (Cin, Cout)
        return jnp.einsum('nhwc,cd->nhwd', v, w)

    out = conv1x1(x, w1) * s1 + b1
    out = jnp.maximum(out, 0.0)
    out = jax.lax.conv_general_dilated(
        out, w2, window_strides=(1, 1), padding=((1, 1), (1, 1)),
        dimension_numbers=('NHWC', 'HWIO', 'NHWC'))
    out = out * s2 + b2
    out = jnp.maximum(out, 0.0)
    out = conv1x1(out, w3) * s3 + b3
    out = out + residual
    return jnp.transpose(out, (0, 3, 1, 2))


# --------------------------------------------------------------------------
# Parameter construction (deterministic, folded-BN form)
# --------------------------------------------------------------------------

def make_params(key, inplanes, planes, eps=1e-5):
    C4 = planes * 4
    ks = jax.random.split(key, 15)

    def bn_fold(kg, kb, km, kv, c):
        gamma = 1.0 + 0.1 * jax.random.normal(kg, (c,), jnp.float32)
        beta = 0.1 * jax.random.normal(kb, (c,), jnp.float32)
        mean = 0.1 * jax.random.normal(km, (c,), jnp.float32)
        var = jnp.abs(jax.random.normal(kv, (c,), jnp.float32)) + 0.5
        scale = gamma / jnp.sqrt(var + eps)
        bias = beta - mean * scale
        return scale, bias

    w1 = 0.1 * jax.random.normal(ks[0], (inplanes, planes), jnp.float32)
    w2 = 0.1 * jax.random.normal(ks[1], (3, 3, planes, planes), jnp.float32)
    w3 = 0.1 * jax.random.normal(ks[2], (planes, C4), jnp.float32)
    s1, b1 = bn_fold(ks[3], ks[4], ks[5], ks[6], planes)
    s2, b2 = bn_fold(ks[7], ks[8], ks[9], ks[10], planes)
    s3, b3 = bn_fold(ks[11], ks[12], ks[13], ks[14], C4)
    return (w1, s1, b1, w2, s2, b2, w3, s3, b3)


# --------------------------------------------------------------------------

if __name__ == "__main__":
    key = jax.random.PRNGKey(0)
    k_x, k_p = jax.random.split(key)

    # small shapes: batch=2, planes=4, inplanes=4*planes=16, spatial=16
    N, planes, H, W = 2, 4, 16, 16
    inplanes = planes * 4
    x = jax.random.normal(k_x, (N, inplanes, H, W), jnp.float32)
    params = make_params(k_p, inplanes, planes)

    fwd = jax.jit(bottleneck_forward)
    out = jax.block_until_ready(fwd(x, params))

    ref = jax.block_until_ready(jax.jit(bottleneck_reference)(x, params))
    assert out.shape == (N, inplanes, H, W)
    assert jnp.allclose(out, ref, atol=1e-3, rtol=1e-3), "mismatch vs reference"

    print("KERNEL_OK")
</pallas_src>

<mosaic_0001>
module attributes {stable_mosaic.version = 11 : i64} {
  func.func @_fused_bottleneck_kernel(%arg0: i32, %arg1: i32, %arg2: memref<1x16x16x128xf32, #tpu.memory_space<vmem>>, %arg3: memref<128x128xf32, #tpu.memory_space<vmem>>, %arg4: memref<1x128xf32, #tpu.memory_space<vmem>>, %arg5: memref<1x128xf32, #tpu.memory_space<vmem>>, %arg6: memref<3x384x128xf32, #tpu.memory_space<vmem>>, %arg7: memref<1x128xf32, #tpu.memory_space<vmem>>, %arg8: memref<1x128xf32, #tpu.memory_space<vmem>>, %arg9: memref<128x128xf32, #tpu.memory_space<vmem>>, %arg10: memref<1x128xf32, #tpu.memory_space<vmem>>, %arg11: memref<1x128xf32, #tpu.memory_space<vmem>>, %arg12: memref<1x8x16x128xf32, #tpu.memory_space<vmem>>, %arg13: memref<18x18x128xf32, #tpu.memory_space<vmem>>) attributes {dimension_semantics = [#tpu.dimension_semantics<parallel>, #tpu.dimension_semantics<arbitrary>], iteration_bounds = array<i64: 2, 2>, scalar_prefetch = 0 : i64, scratch_operands = 1 : i64, tpu.core_type = #tpu.core_type<tc>, window_params = [{transform_indices = @transform_0, window_bounds = array<i64: 1, 16, 16, 128>}, {pipeline_mode = #tpu.pipeline_mode<synchronous>, transform_indices = @transform_1, window_bounds = array<i64: 128, 128>}, {pipeline_mode = #tpu.pipeline_mode<synchronous>, transform_indices = @transform_2, window_bounds = array<i64: 1, 128>}, {pipeline_mode = #tpu.pipeline_mode<synchronous>, transform_indices = @transform_3, window_bounds = array<i64: 1, 128>}, {pipeline_mode = #tpu.pipeline_mode<synchronous>, transform_indices = @transform_4, window_bounds = array<i64: 3, 384, 128>}, {pipeline_mode = #tpu.pipeline_mode<synchronous>, transform_indices = @transform_5, window_bounds = array<i64: 1, 128>}, {pipeline_mode = #tpu.pipeline_mode<synchronous>, transform_indices = @transform_6, window_bounds = array<i64: 1, 128>}, {pipeline_mode = #tpu.pipeline_mode<synchronous>, transform_indices = @transform_7, window_bounds = array<i64: 128, 128>}, {pipeline_mode = #tpu.pipeline_mode<synchronous>, transform_indices = @transform_8, window_bounds = array<i64: 1, 128>}, {pipeline_mode = #tpu.pipeline_mode<synchronous>, transform_indices = @transform_9, window_bounds = array<i64: 1, 128>}, {transform_indices = @transform_10, window_bounds = array<i64: 1, 8, 16, 128>}]} {
    %c0_i32 = arith.constant 0 : i32
    %0 = arith.cmpi eq, %arg1, %c0_i32 : i32
    %1 = arith.extui %0 : i1 to i32
    %c0_i32_0 = arith.constant 0 : i32
    %2 = arith.cmpi ne, %1, %c0_i32_0 : i32
    scf.if %2 {
      %cst_37 = arith.constant 0.000000e+00 : f32
      %66 = vector.broadcast %cst_37 : f32 to vector<18x128xf32>
      %c0_38 = arith.constant 0 : index
      %c0_39 = arith.constant 0 : index
      %c0_40 = arith.constant 0 : index
      %67 = vector.load %arg13[%c0_38, %c0_39, %c0_40] : memref<18x18x128xf32, #tpu.memory_space<vmem>>, vector<1x18x128xf32>
      %68 = vector.shape_cast %67 : vector<1x18x128xf32> to vector<18x128xf32>
      %69 = vector.shape_cast %66 : vector<18x128xf32> to vector<1x18x128xf32>
      tpu.vector_store %arg13[%c0_38, %c0_39, %c0_40], %69 {strides = array<i32>} : memref<18x18x128xf32, #tpu.memory_space<vmem>>, vector<1x18x128xf32>,
      %cst_41 = arith.constant 0.000000e+00 : f32
      %70 = vector.broadcast %cst_41 : f32 to vector<18x128xf32>
      %c17 = arith.constant 17 : index
      %c0_42 = arith.constant 0 : index
      %c0_43 = arith.constant 0 : index
      %71 = vector.load %arg13[%c17, %c0_42, %c0_43] : memref<18x18x128xf32, #tpu.memory_space<vmem>>, vector<1x18x128xf32>
      %72 = vector.shape_cast %71 : vector<1x18x128xf32> to vector<18x128xf32>
      %73 = vector.shape_cast %70 : vector<18x128xf32> to vector<1x18x128xf32>
      tpu.vector_store %arg13[%c17, %c0_42, %c0_43], %73 {strides = array<i32>} : memref<18x18x128xf32, #tpu.memory_space<vmem>>, vector<1x18x128xf32>,
      %c0_44 = arith.constant 0 : index
      %c0_45 = arith.constant 0 : index
      %74 = vector.load %arg3[%c0_44, %c0_45] : memref<128x128xf32, #tpu.memory_space<vmem>>, vector<128x128xf32>
      %c0_46 = arith.constant 0 : index
      %c0_47 = arith.constant 0 : index
      %75 = vector.load %arg4[%c0_46, %c0_47] : memref<1x128xf32, #tpu.memory_space<vmem>>, vector<1x128xf32>
      %c0_48 = arith.constant 0 : index
      %c0_49 = arith.constant 0 : index
      %76 = vector.load %arg5[%c0_48, %c0_49] : memref<1x128xf32, #tpu.memory_space<vmem>>, vector<1x128xf32>
      %cst_50 = arith.constant 0.000000e+00 : f32
      %77 = vector.broadcast %cst_50 : f32 to vector<8x1x128xf32>
      %c0_51 = arith.constant 0 : index
      %c0_52 = arith.constant 0 : index
      %c0_53 = arith.constant 0 : index
      %c0_54 = arith.constant 0 : index
      %78 = vector.load %arg2[%c0_51, %c0_52, %c0_53, %c0_54] : memref<1x16x16x128xf32, #tpu.memory_space<vmem>>, vector<1x8x16x128xf32>
      %79 = vector.shape_cast %78 : vector<1x8x16x128xf32> to vector<8x16x128xf32>
      %80 = vector.shape_cast %79 : vector<8x16x128xf32> to vector<128x128xf32>
      %cst_55 = arith.constant 0.000000e+00 : f32
      %81 = vector.broadcast %cst_55 : f32 to vector<128x128xf32>
      %82 = arith.maximumf %80, %81 : vector<128x128xf32>
      %cst_56 = arith.constant dense<0.000000e+00> : vector<128x128xf32>
      %83 = tpu.matmul %82, %74, %cst_56 {dimension_numbers = #tpu.dot_dimension_numbers<[1], [0], [0], [1], [0, 0, 1, 1], [], []>} : vector<128x128xf32>, vector<128x128xf32>, vector<128x128xf32> -> vector<128x128xf32>
      %84 = vector.broadcast %75 : vector<1x128xf32> to vector<128x128xf32>
      %85 = arith.mulf %83, %84 : vector<128x128xf32>
      %86 = vector.broadcast %76 : vector<1x128xf32> to vector<128x128xf32>
      %87 = arith.addf %85, %86 : vector<128x128xf32>
      %cst_57 = arith.constant 0.000000e+00 : f32
      %88 = vector.broadcast %cst_57 : f32 to vector<128x128xf32>
      %89 = arith.maximumf %87, %88 : vector<128x128xf32>
      %90 = vector.shape_cast %89 : vector<128x128xf32> to vector<8x16x128xf32>
      %91 = tpu.concatenate %77, %90, %77 in 1 : vector<8x1x128xf32>, vector<8x16x128xf32>, vector<8x1x128xf32> -> vector<8x18x128xf32>
      %c1_58 = arith.constant 1 : index
      %c0_59 = arith.constant 0 : index
      %c0_60 = arith.constant 0 : index
      %92 = vector.load %arg13[%c1_58, %c0_59, %c0_60] : memref<18x18x128xf32, #tpu.memory_space<vmem>>, vector<8x18x128xf32>
      tpu.vector_store %arg13[%c1_58, %c0_59, %c0_60], %91 {strides = array<i32>} : memref<18x18x128xf32, #tpu.memory_space<vmem>>, vector<8x18x128xf32>,
      %c0_61 = arith.constant 0 : index
      %c8 = arith.constant 8 : index
      %c0_62 = arith.constant 0 : index
      %c0_63 = arith.constant 0 : index
      %93 = vector.load %arg2[%c0_61, %c8, %c0_62, %c0_63] : memref<1x16x16x128xf32, #tpu.memory_space<vmem>>, vector<1x8x16x128xf32>
      %94 = vector.shape_cast %93 : vector<1x8x16x128xf32> to vector<8x16x128xf32>
      %95 = vector.shape_cast %94 : vector<8x16x128xf32> to vector<128x128xf32>
      %cst_64 = arith.constant 0.000000e+00 : f32
      %96 = vector.broadcast %cst_64 : f32 to vector<128x128xf32>
      %97 = arith.maximumf %95, %96 : vector<128x128xf32>
      %cst_65 = arith.constant dense<0.000000e+00> : vector<128x128xf32>
      %98 = tpu.matmul %97, %74, %cst_65 {dimension_numbers = #tpu.dot_dimension_numbers<[1], [0], [0], [1], [0, 0, 1, 1], [], []>} : vector<128x128xf32>, vector<128x128xf32>, vector<128x128xf32> -> vector<128x128xf32>
      %99 = vector.broadcast %75 : vector<1x128xf32> to vector<128x128xf32>
      %100 = arith.mulf %98, %99 : vector<128x128xf32>
      %101 = vector.broadcast %76 : vector<1x128xf32> to vector<128x128xf32>
      %102 = arith.addf %100, %101 : vector<128x128xf32>
      %cst_66 = arith.constant 0.000000e+00 : f32
      %103 = vector.broadcast %cst_66 : f32 to vector<128x128xf32>
      %104 = arith.maximumf %102, %103 : vector<128x128xf32>
      %105 = vector.shape_cast %104 : vector<128x128xf32> to vector<8x16x128xf32>
      %106 = tpu.concatenate %77, %105, %77 in 1 : vector<8x1x128xf32>, vector<8x16x128xf32>, vector<8x1x128xf32> -> vector<8x18x128xf32>
      %c9 = arith.constant 9 : index
      %c0_67 = arith.constant 0 : index
      %c0_68 = arith.constant 0 : index
      %107 = vector.load %arg13[%c9, %c0_67, %c0_68] : memref<18x18x128xf32, #tpu.memory_space<vmem>>, vector<8x18x128xf32>
      tpu.vector_store %arg13[%c9, %c0_67, %c0_68], %106 {strides = array<i32>} : memref<18x18x128xf32, #tpu.memory_space<vmem>>, vector<8x18x128xf32>,
    } else {
    }
    %c8_i32 = arith.constant 8 : i32
    %3 = arith.muli %arg1, %c8_i32 : i32
    %cst = arith.constant 0.000000e+00 : f32
    %4 = vector.broadcast %cst : f32 to vector<128x128xf32>
    %c0_i32_1 = arith.constant 0 : i32
    %5 = arith.addi %3, %c0_i32_1 : i32
    %6 = arith.index_cast %5 : i32 to index
    %c0 = arith.constant 0 : index
    %c0_2 = arith.constant 0 : index
    %7 = vector.load %arg13[%6, %c0, %c0_2] : memref<18x18x128xf32, #tpu.memory_space<vmem>>, vector<8x18x128xf32>
    %8 = vector.extract_strided_slice %7 {offsets = [0, 0, 0], sizes = [8, 16, 128], strides = [1, 1, 1]} : vector<8x18x128xf32> to vector<8x16x128xf32>
    %9 = vector.extract_strided_slice %7 {offsets = [0, 1, 0], sizes = [8, 16, 128], strides = [1, 1, 1]} : vector<8x18x128xf32> to vector<8x16x128xf32>
    %10 = vector.extract_strided_slice %7 {offsets = [0, 2, 0], sizes = [8, 16, 128], strides = [1, 1, 1]} : vector<8x18x128xf32> to vector<8x16x128xf32>
    %11 = tpu.concatenate %8, %9, %10 in 2 : vector<8x16x128xf32>, vector<8x16x128xf32>, vector<8x16x128xf32> -> vector<8x16x384xf32>
    %12 = vector.shape_cast %11 : vector<8x16x384xf32> to vector<128x384xf32>
    %c0_3 = arith.constant 0 : index
    %c0_4 = arith.constant 0 : index
    %c0_5 = arith.constant 0 : index
    %13 = vector.load %arg6[%c0_3, %c0_4, %c0_5] : memref<3x384x128xf32, #tpu.memory_space<vmem>>, vector<1x384x128xf32>
    %14 = vector.shape_cast %13 : vector<1x384x128xf32> to vector<384x128xf32>
    %cst_6 = arith.constant dense<0.000000e+00> : vector<128x128xf32>
    %15 = tpu.matmul %12, %14, %cst_6 {dimension_numbers = #tpu.dot_dimension_numbers<[1], [0], [0], [1], [0, 0, 1, 1], [], []>} : vector<128x384xf32>, vector<384x128xf32>, vector<128x128xf32> -> vector<128x128xf32>
    %16 = arith.addf %4, %15 : vector<128x128xf32>
    %c1_i32 = arith.constant 1 : i32
    %17 = arith.addi %3, %c1_i32 : i32
    %18 = arith.index_cast %17 : i32 to index
    %c0_7 = arith.constant 0 : index
    %c0_8 = arith.constant 0 : index
    %19 = vector.load %arg13[%18, %c0_7, %c0_8] : memref<18x18x128xf32, #tpu.memory_space<vmem>>, vector<8x18x128xf32>
    %20 = vector.extract_strided_slice %19 {offsets = [0, 0, 0], sizes = [8, 16, 128], strides = [1, 1, 1]} : vector<8x18x128xf32> to vector<8x16x128xf32>
    %21 = vector.extract_strided_slice %19 {offsets = [0, 1, 0], sizes = [8, 16, 128], strides = [1, 1, 1]} : vector<8x18x128xf32> to vector<8x16x128xf32>
    %22 = vector.extract_strided_slice %19 {offsets = [0, 2, 0], sizes = [8, 16, 128], strides = [1, 1, 1]} : vector<8x18x128xf32> to vector<8x16x128xf32>
    %23 = tpu.concatenate %20, %21, %22 in 2 : vector<8x16x128xf32>, vector<8x16x128xf32>, vector<8x16x128xf32> -> vector<8x16x384xf32>
    %24 = vector.shape_cast %23 : vector<8x16x384xf32> to vector<128x384xf32>
    %c1 = arith.constant 1 : index
    %c0_9 = arith.constant 0 : index
    %c0_10 = arith.constant 0 : index
    %25 = vector.load %arg6[%c1, %c0_9, %c0_10] : memref<3x384x128xf32, #tpu.memory_space<vmem>>, vector<1x384x128xf32>
    %26 = vector.shape_cast %25 : vector<1x384x128xf32> to vector<384x128xf32>
    %cst_11 = arith.constant dense<0.000000e+00> : vector<128x128xf32>
    %27 = tpu.matmul %24, %26, %cst_11 {dimension_numbers = #tpu.dot_dimension_numbers<[1], [0], [0], [1], [0, 0, 1, 1], [], []>} : vector<128x384xf32>, vector<384x128xf32>, vector<128x128xf32> -> vector<128x128xf32>
    %28 = arith.addf %16, %27 : vector<128x128xf32>
    %c2_i32 = arith.constant 2 : i32
    %29 = arith.addi %3, %c2_i32 : i32
    %30 = arith.index_cast %29 : i32 to index
    %c0_12 = arith.constant 0 : index
    %c0_13 = arith.constant 0 : index
    %31 = vector.load %arg13[%30, %c0_12, %c0_13] : memref<18x18x128xf32, #tpu.memory_space<vmem>>, vector<8x18x128xf32>
    %32 = vector.extract_strided_slice %31 {offsets = [0, 0, 0], sizes = [8, 16, 128], strides = [1, 1, 1]} : vector<8x18x128xf32> to vector<8x16x128xf32>
    %33 = vector.extract_strided_slice %31 {offsets = [0, 1, 0], sizes = [8, 16, 128], strides = [1, 1, 1]} : vector<8x18x128xf32> to vector<8x16x128xf32>
    %34 = vector.extract_strided_slice %31 {offsets = [0, 2, 0], sizes = [8, 16, 128], strides = [1, 1, 1]} : vector<8x18x128xf32> to vector<8x16x128xf32>
    %35 = tpu.concatenate %32, %33, %34 in 2 : vector<8x16x128xf32>, vector<8x16x128xf32>, vector<8x16x128xf32> -> vector<8x16x384xf32>
    %36 = vector.shape_cast %35 : vector<8x16x384xf32> to vector<128x384xf32>
    %c2 = arith.constant 2 : index
    %c0_14 = arith.constant 0 : index
    %c0_15 = arith.constant 0 : index
    %37 = vector.load %arg6[%c2, %c0_14, %c0_15] : memref<3x384x128xf32, #tpu.memory_space<vmem>>, vector<1x384x128xf32>
    %38 = vector.shape_cast %37 : vector<1x384x128xf32> to vector<384x128xf32>
    %cst_16 = arith.constant dense<0.000000e+00> : vector<128x128xf32>
    %39 = tpu.matmul %36, %38, %cst_16 {dimension_numbers = #tpu.dot_dimension_numbers<[1], [0], [0], [1], [0, 0, 1, 1], [], []>} : vector<128x384xf32>, vector<384x128xf32>, vector<128x128xf32> -> vector<128x128xf32>
    %40 = arith.addf %28, %39 : vector<128x128xf32>
    %c0_17 = arith.constant 0 : index
    %c0_18 = arith.constant 0 : index
    %41 = vector.load %arg7[%c0_17, %c0_18] : memref<1x128xf32, #tpu.memory_space<vmem>>, vector<1x128xf32>
    %42 = vector.broadcast %41 : vector<1x128xf32> to vector<128x128xf32>
    %43 = arith.mulf %40, %42 : vector<128x128xf32>
    %c0_19 = arith.constant 0 : index
    %c0_20 = arith.constant 0 : index
    %44 = vector.load %arg8[%c0_19, %c0_20] : memref<1x128xf32, #tpu.memory_space<vmem>>, vector<1x128xf32>
    %45 = vector.broadcast %44 : vector<1x128xf32> to vector<128x128xf32>
    %46 = arith.addf %43, %45 : vector<128x128xf32>
    %cst_21 = arith.constant 0.000000e+00 : f32
    %47 = vector.broadcast %cst_21 : f32 to vector<128x128xf32>
    %48 = arith.maximumf %46, %47 : vector<128x128xf32>
    %c0_22 = arith.constant 0 : index
    %c0_23 = arith.constant 0 : index
    %49 = vector.load %arg9[%c0_22, %c0_23] : memref<128x128xf32, #tpu.memory_space<vmem>>, vector<128x128xf32>
    %cst_24 = arith.constant dense<0.000000e+00> : vector<128x128xf32>
    %50 = tpu.matmul %48, %49, %cst_24 {dimension_numbers = #tpu.dot_dimension_numbers<[1], [0], [0], [1], [0, 0, 1, 1], [], []>} : vector<128x128xf32>, vector<128x128xf32>, vector<128x128xf32> -> vector<128x128xf32>
    %c0_25 = arith.constant 0 : index
    %c0_26 = arith.constant 0 : index
    %51 = vector.load %arg10[%c0_25, %c0_26] : memref<1x128xf32, #tpu.memory_space<vmem>>, vector<1x128xf32>
    %52 = vector.broadcast %51 : vector<1x128xf32> to vector<128x128xf32>
    %53 = arith.mulf %50, %52 : vector<128x128xf32>
    %c0_27 = arith.constant 0 : index
    %c0_28 = arith.constant 0 : index
    %54 = vector.load %arg11[%c0_27, %c0_28] : memref<1x128xf32, #tpu.memory_space<vmem>>, vector<1x128xf32>
    %55 = vector.broadcast %54 : vector<1x128xf32> to vector<128x128xf32>
    %56 = arith.addf %53, %55 : vector<128x128xf32>
    %c0_29 = arith.constant 0 : index
    %57 = arith.index_cast %3 : i32 to index
    %c0_30 = arith.constant 0 : index
    %c0_31 = arith.constant 0 : index
    %58 = vector.load %arg2[%c0_29, %57, %c0_30, %c0_31] : memref<1x16x16x128xf32, #tpu.memory_space<vmem>>, vector<1x8x16x128xf32>
    %59 = vector.shape_cast %58 : vector<1x8x16x128xf32> to vector<8x16x128xf32>
    %cst_32 = arith.constant 0.000000e+00 : f32
    %60 = vector.broadcast %cst_32 : f32 to vector<8x16x128xf32>
    %61 = arith.maximumf %59, %60 : vector<8x16x128xf32>
    %62 = vector.shape_cast %61 : vector<8x16x128xf32> to vector<128x128xf32>
    %63 = arith.addf %56, %62 : vector<128x128xf32>
    %64 = vector.shape_cast %63 : vector<128x128xf32> to vector<1x8x16x128xf32>
    %c0_33 = arith.constant 0 : index
    %c0_34 = arith.constant 0 : index
    %c0_35 = arith.constant 0 : index
    %c0_36 = arith.constant 0 : index
    %65 = vector.load %arg12[%c0_33, %c0_34, %c0_35, %c0_36] : memref<1x8x16x128xf32, #tpu.memory_space<vmem>>, vector<1x8x16x128xf32>
    tpu.vector_store %arg12[%c0_33, %c0_34, %c0_35, %c0_36], %64 {strides = array<i32>} : memref<1x8x16x128xf32, #tpu.memory_space<vmem>>, vector<1x8x16x128xf32>,
    return
  }
  func.func @transform_0(%arg0: i32, %arg1: i32) -> (i32, i32, i32, i32) {
    %c0_i32 = arith.constant 0 : i32
    %c0_i32_0 = arith.constant 0 : i32
    %c0_i32_1 = arith.constant 0 : i32
    %c0_i32_2 = arith.constant 0 : i32
    return %arg0, %c0_i32, %c0_i32_0, %c0_i32_1 : i32, i32, i32, i32
  }
  func.func @transform_1(%arg0: i32, %arg1: i32) -> (i32, i32) {
    %c0_i32 = arith.constant 0 : i32
    %c0_i32_0 = arith.constant 0 : i32
    %c0_i32_1 = arith.constant 0 : i32
    return %c0_i32, %c0_i32_0 : i32, i32
  }
  func.func @transform_2(%arg0: i32, %arg1: i32) -> (i32, i32) {
    %c0_i32 = arith.constant 0 : i32
    %c0_i32_0 = arith.constant 0 : i32
    %c0_i32_1 = arith.constant 0 : i32
    return %c0_i32, %c0_i32_0 : i32, i32
  }
  func.func @transform_3(%arg0: i32, %arg1: i32) -> (i32, i32) {
    %c0_i32 = arith.constant 0 : i32
    %c0_i32_0 = arith.constant 0 : i32
    %c0_i32_1 = arith.constant 0 : i32
    return %c0_i32, %c0_i32_0 : i32, i32
  }
  func.func @transform_4(%arg0: i32, %arg1: i32) -> (i32, i32, i32) {
    %c0_i32 = arith.constant 0 : i32
    %c0_i32_0 = arith.constant 0 : i32
    %c0_i32_1 = arith.constant 0 : i32
    %c0_i32_2 = arith.constant 0 : i32
    return %c0_i32, %c0_i32_0, %c0_i32_1 : i32, i32, i32
  }
  func.func @transform_5(%arg0: i32, %arg1: i32) -> (i32, i32) {
    %c0_i32 = arith.constant 0 : i32
    %c0_i32_0 = arith.constant 0 : i32
    %c0_i32_1 = arith.constant 0 : i32
    return %c0_i32, %c0_i32_0 : i32, i32
  }
  func.func @transform_6(%arg0: i32, %arg1: i32) -> (i32, i32) {
    %c0_i32 = arith.constant 0 : i32
    %c0_i32_0 = arith.constant 0 : i32
    %c0_i32_1 = arith.constant 0 : i32
    return %c0_i32, %c0_i32_0 : i32, i32
  }
  func.func @transform_7(%arg0: i32, %arg1: i32) -> (i32, i32) {
    %c0_i32 = arith.constant 0 : i32
    %c0_i32_0 = arith.constant 0 : i32
    %c0_i32_1 = arith.constant 0 : i32
    return %c0_i32, %c0_i32_0 : i32, i32
  }
  func.func @transform_8(%arg0: i32, %arg1: i32) -> (i32, i32) {
    %c0_i32 = arith.constant 0 : i32
    %c0_i32_0 = arith.constant 0 : i32
    %c0_i32_1 = arith.constant 0 : i32
    return %c0_i32, %c0_i32_0 : i32, i32
  }
  func.func @transform_9(%arg0: i32, %arg1: i32) -> (i32, i32) {
    %c0_i32 = arith.constant 0 : i32
    %c0_i32_0 = arith.constant 0 : i32
    %c0_i32_1 = arith.constant 0 : i32
    return %c0_i32, %c0_i32_0 : i32, i32
  }
  func.func @transform_10(%arg0: i32, %arg1: i32) -> (i32, i32, i32, i32) {
    %c0_i32 = arith.constant 0 : i32
    %c0_i32_0 = arith.constant 0 : i32
    %c0_i32_1 = arith.constant 0 : i32
    return %arg0, %arg1, %c0_i32, %c0_i32_0 : i32, i32, i32, i32
  }
}

</mosaic_0001>

<bundles_post_ra>
// kernel: bottleneck_forward.1
= control target key start
LH: loop header
LB: loop body
LE: loop exit
PB: predicated region body
PF: predicated region fallthrough
CT: control target
= control target key end

     0   :  { %s4144_s13 = smov 0   ;;  %s4146_s14 = smov 0   ;;  %s5719_s0 = inlined_call_operand.vmem [shape: f32[2,16,16,128], index: 0, kind: input, shape index: {}]   ;;  %s5720_s1 = inlined_call_operand.vmem [shape: f32[128,128], index: 1, kind: input, shape index: {}]   ;;  %s5721_s2 = inlined_call_operand.vmem [shape: f32[1,128], index: 2, kind: input, shape index: {}]   ;;  %s5722_s3 = inlined_call_operand.vmem [shape: f32[1,128], index: 3, kind: input, shape index: {}]   ;;  %s5723_s4 = inlined_call_operand.vmem [shape: f32[3,384,128], index: 4, kind: input, shape index: {}]   ;;  %s5724_s5 = inlined_call_operand.vmem [shape: f32[1,128], index: 5, kind: input, shape index: {}]   ;;  %s5725_s6 = inlined_call_operand.vmem [shape: f32[1,128], index: 6, kind: input, shape index: {}]   ;;  %s5726_s7 = inlined_call_operand.vmem [shape: f32[128,128], index: 7, kind: input, shape index: {}]   ;;  %s5727_s8 = inlined_call_operand.vmem [shape: f32[1,128], index: 8, kind: input, shape index: {}]   ;;  %s5728_s9 = inlined_call_operand.vmem [shape: f32[1,128], index: 9, kind: input, shape index: {}]   ;;  %s5729_s10 = inlined_call_operand.vmem [shape: f32[2,16,16,128], index: 10, kind: output, shape index: {}]  }
   0x1   :  { %s4148_s15 = smov 0   ;;  %s4150_s16 = smov 0  }
   0x2   :  { %s4152_s17 = smov 0  }
   0x3 LB: > { %s29_s18 = sadd.s32 1, %s4078_s15  ;;  %s32_s19 = sadd.s32 1, %s4082_s16  ;;  %s4086_s17 = sphi %s4152_s17, %s20_s17   ;;  %s4082_s16 = sphi %s4150_s16, %s5827_s16   ;;  %s4078_s15 = sphi %s4148_s15, %s5826_s15   ;;  %s4074_s14 = sphi %s4146_s14, %s5825_s14   ;;  %s4070_s13 = sphi %s4144_s13, %s5824_s13  }
   0x4   : > { %p30_p0 = scmp.ge.s32.totalorder %s29_s18, 2  ;;  %p3052_p1 = scmp.ge.s32.totalorder %s4086_s17, 1 }
   0x5   : > { %p326_p2 = scmp.lt.s32.totalorder %s4086_s17, 5 }
   0x6   : > { %s5829_s18 = smov (%p30_p0, %s29_s18), 0  ;;  %s5831_s19 = smov (!%p30_p0, %s32_s19), %s4082_s16 }
   0x7   : > { %5747 = sst [smem:[#allocation3_spill]] %s5829_s18  ;;  %p327_p3 = pnand %p3052_p1, %p326_p2 }
   0x8   : > { %p34_p4 = scmp.ge.s32.totalorder %s5831_s19, 2 }
   0x9   : > { %330 = sbr.rel (%p327_p3) target bundleno = 918 (0x396), region = 60 }
   0xa   : > { %s5833_s19 = smov (%p34_p4, %s5831_s19), 0 }
   0xb   : > { %5748 = sst [smem:[#allocation4_spill]] %s5833_s19 }
   0xe   : > { %p369_p5 = scmp.lt.s32.totalorder %s4074_s14, 1  ;;  %s3055_s20 = sshll.u32 %s4070_s13, 3 }
   0xf   : > { %p377_p6 = scmp.lt.s32.totalorder %s3055_s20, 15  ;;  %p3059_p7 = scmp.ne.s32.totalorder %s4070_s13, 0 }
  0x10   : > { %s5835_s14 = smov (!%p369_p5, %s4074_s14), 1 }
  0x11   : > { %s5837_s20 = smov (!%p377_p6, %s3055_s20), 15  ;;  %s3235_s21 = sshll.u32 %s5835_s14, 8 }
  0x12   : > { %s3057_s22 = sshll.u32 %s5835_s14, 5  ;;  %s4180_s25 = scalar_lea.vmem %s5719_s0, %s3235_s21 }
  0x13   : > { %s3056_s26 = sshll.u32 %s5837_s20, 1  ;;  %388 = sbr.rel (%p3059_p7) target bundleno = 303 (0x12f), region = 64 }
  0x14   : > { %s381_s27 = sadd.s32 %s3057_s22, %s3056_s26 }
  0x15   : > { %s3058_s28 = sshll.u32 %s381_s27, 3 }
  0x16   : > { %s4185_s11 = scalar_lea.vmem %s5729_s10, %s3058_s28 }
  0x18   : > { %v411_v0 = vld [vmem:[%s5720_s1 + $0x78] sm:$0xff]  ;;  %v410_v1 = vld [vmem:[%s5720_s1 + $0x70] sm:$0xff]  ;;  %v4088_v2 = vmov 0.0   ;;  %v409_v3 = vld [vmem:[%s5720_s1 + $0x68] sm:$0xff]  ;;  %vm667_vm0 = vcmask 1040384  }
  0x19   : > { %389 = vst [vmem:[#allocation2] sm:$0xff] %v4088_v2  ;;  %390 = vst [vmem:[#allocation2 + $0x8] sm:$0xff] %v4088_v2  ;;  %3669 = vmatprep.subr.mxu0 %v411_v0  ;;  %3725 = vmatprep.subr.mxu1 %v411_v0  ;;  %v408_v4 = vld [vmem:[%s5720_s1 + $0x60] sm:$0xff]  ;;  %v407_v5 = vld [vmem:[%s5720_s1 + $0x58] sm:$0xff] }
  0x1a   : > { %391 = vst [vmem:[#allocation2 + $0x10] sm:$0x3] %v4088_v2  ;;  %393 = vst [vmem:[#allocation2 + $0x198] sm:$0xff] %v4088_v2  ;;  %3670 = vmatpush3.msra.mxu0 %v411_v0  ;;  %3726 = vmatpush3.msra.mxu1 %v411_v0  ;;  %v406_v6 = vld [vmem:[%s5720_s1 + $0x50] sm:$0xff]  ;;  %v405_v7 = vld [vmem:[%s5720_s1 + $0x48] sm:$0xff] }
  0x1b   : > { %394 = vst [vmem:[#allocation2 + $0x1a0] sm:$0xff] %v4088_v2  ;;  %395 = vst [vmem:[#allocation2 + $0x1a8] sm:$0x3] %v4088_v2  ;;  %3671 = vmatprep.subr.mxu0 %v410_v1  ;;  %3727 = vmatprep.subr.mxu1 %v410_v1  ;;  %v404_v8 = vld [vmem:[%s5720_s1 + $0x40] sm:$0xff]  ;;  %v403_v9 = vld [vmem:[%s5720_s1 + $0x38] sm:$0xff] }
  0x1c   : > { %3672 = vmatpush3.msra.mxu0 %v410_v1  ;;  %3728 = vmatpush3.msra.mxu1 %v410_v1  ;;  %v402_v10 = vld [vmem:[%s5720_s1 + $0x30] sm:$0xff]  ;;  %v401_v11 = vld [vmem:[%s5720_s1 + $0x28] sm:$0xff]  ;;  %v400_v12 = vld [vmem:[%s5720_s1 + $0x20] sm:$0xff] }
  0x1d   : > { %3673 = vmatprep.subr.mxu0 %v409_v3  ;;  %3729 = vmatprep.subr.mxu1 %v409_v3  ;;  %v399_v13 = vld [vmem:[%s5720_s1 + $0x18] sm:$0xff]  ;;  %v398_v14 = vld [vmem:[%s5720_s1 + $0x10] sm:$0xff]  ;;  %v414_v15 = vld [vmem:[%s4180_s25] sm:$0xff] }
  0x1e   : > { %3674 = vmatpush3.msra.mxu0 %v409_v3  ;;  %3730 = vmatpush3.msra.mxu1 %v409_v3  ;;  %v397_v16 = vld [vmem:[%s5720_s1 + $0x8] sm:$0xff]  ;;  %v3062_v17 = vld [vmem:[%s4180_s25 + $0x80] sm:$0xff]  ;;  %v430_v21 = vmax.f32 %v414_v15, 0.0  ;;  %v416_v22 = vld [vmem:[%s4180_s25 + $0x10] sm:$0xff] }
  0x1f   : > { %3675 = vmatprep.subr.mxu0 %v408_v4  ;;  %3731 = vmatprep.subr.mxu1 %v408_v4  ;;  %v415_v18 = vld [vmem:[%s4180_s25 + $0x8] sm:$0xff]  ;;  %v396_v20 = vld [vmem:[%s5720_s1] sm:$0xff]  ;;  %v3064_v23 = vld [vmem:[%s4180_s25 + $0x90] sm:$0xff]  ;;  %v774_v24 = vmax.f32 %v3062_v17, 0.0  ;;  %v432_v27 = vmax.f32 %v416_v22, 0.0 }
  0x20   : > { %3676 = vmatpush3.msra.mxu0 %v408_v4  ;;  %3732 = vmatpush3.msra.mxu1 %v408_v4  ;;  %v3063_v19 = vld [vmem:[%s4180_s25 + $0x88] sm:$0xff]  ;;  %v431_v25 = vmax.f32 %v415_v18, 0.0  ;;  %v776_v28 = vmax.f32 %v3064_v23, 0.0  ;;  %v417_v29 = vld [vmem:[%s4180_s25 + $0x18] sm:$0xff]  ;;  %v418_v31 = vld [vmem:[%s4180_s25 + $0x20] sm:$0xff] }
  0x21   : > { %3677 = vmatprep.subr.mxu0 %v407_v5  ;;  %3733 = vmatprep.subr.mxu1 %v407_v5  ;;  %v775_v26 = vmax.f32 %v3063_v19, 0.0  ;;  %v3065_v30 = vld [vmem:[%s4180_s25 + $0x98] sm:$0xff]  ;;  %v3066_v32 = vld [vmem:[%s4180_s25 + $0xa0] sm:$0xff]  ;;  %v433_v33 = vmax.f32 %v417_v29, 0.0  ;;  %v434_v35 = vmax.f32 %v418_v31, 0.0  ;;  %v419_v37 = vld [vmem:[%s4180_s25 + $0x28] sm:$0xff] }
  0x22   : > { %3678 = vmatpush3.msra.mxu0 %v407_v5  ;;  %3734 = vmatpush3.msra.mxu1 %v407_v5  ;;  %v777_v34 = vmax.f32 %v3065_v30, 0.0  ;;  %v778_v36 = vmax.f32 %v3066_v32, 0.0  ;;  %v3067_v38 = vld [vmem:[%s4180_s25 + $0xa8] sm:$0xff]  ;;  %v420_v39 = vld [vmem:[%s4180_s25 + $0x30] sm:$0xff]  ;;  %v435_v41 = vmax.f32 %v419_v37, 0.0  ;;  %v421_v45 = vld [vmem:[%s4180_s25 + $0x38] sm:$0xff] }
  0x23   : > { %3679 = vmatprep.subr.mxu0 %v406_v6  ;;  %3735 = vmatprep.subr.mxu1 %v406_v6  ;;  %v3068_v40 = vld [vmem:[%s4180_s25 + $0xb0] sm:$0xff]  ;;  %v779_v42 = vmax.f32 %v3067_v38, 0.0  ;;  %v436_v43 = vmax.f32 %v420_v39, 0.0  ;;  %v3069_v46 = vld [vmem:[%s4180_s25 + $0xb8] sm:$0xff]  ;;  %v422_v47 = vld [vmem:[%s4180_s25 + $0x40] sm:$0xff]  ;;  %v437_v49 = vmax.f32 %v421_v45, 0.0 }
  0x24   : > { %3680 = vmatpush3.msra.mxu0 %v406_v6  ;;  %3736 = vmatpush3.msra.mxu1 %v406_v6  ;;  %v780_v44 = vmax.f32 %v3068_v40, 0.0  ;;  %v3070_v48 = vld [vmem:[%s4180_s25 + $0xc0] sm:$0xff]  ;;  %v781_v50 = vmax.f32 %v3069_v46, 0.0  ;;  %v438_v51 = vmax.f32 %v422_v47, 0.0  ;;  %v423_v53 = vld [vmem:[%s4180_s25 + $0x48] sm:$0xff]  ;;  %v424_v55 = vld [vmem:[%s4180_s25 + $0x50] sm:$0xff] }
  0x25   : > { %3681 = vmatprep.subr.mxu0 %v405_v7  ;;  %3737 = vmatprep.subr.mxu1 %v405_v7  ;;  %v782_v52 = vmax.f32 %v3070_v48, 0.0  ;;  %v3071_v54 = vld [vmem:[%s4180_s25 + $0xc8] sm:$0xff]  ;;  %v3072_v56 = vld [vmem:[%s4180_s25 + $0xd0] sm:$0xff]  ;;  %v439_v57 = vmax.f32 %v423_v53, 0.0  ;;  %v440_v59 = vmax.f32 %v424_v55, 0.0  ;;  %v425_v61 = vld [vmem:[%s4180_s25 + $0x58] sm:$0xff] }
  0x26   : > { %3682 = vmatpush3.msra.mxu0 %v405_v7  ;;  %3738 = vmatpush3.msra.mxu1 %v405_v7  ;;  %v783_v58 = vmax.f32 %v3071_v54, 0.0  ;;  %v784_v60 = vmax.f32 %v3072_v56, 0.0  ;;  %v3073_v62 = vld [vmem:[%s4180_s25 + $0xd8] sm:$0xff]  ;;  %v426_v63 = vld [vmem:[%s4180_s25 + $0x60] sm:$0xff]  ;;  %v441_v1 = vmax.f32 %v425_v61, 0.0  ;;  %v427_v5 = vld [vmem:[%s4180_s25 + $0x68] sm:$0xff] }
  0x27   : > { %3683 = vmatprep.subr.mxu0 %v404_v8  ;;  %3739 = vmatprep.subr.mxu1 %v404_v8  ;;  %v3074_v0 = vld [vmem:[%s4180_s25 + $0xe0] sm:$0xff]  ;;  %v785_v2 = vmax.f32 %v3073_v62, 0.0  ;;  %v442_v3 = vmax.f32 %v426_v63, 0.0  ;;  %v3075_v6 = vld [vmem:[%s4180_s25 + $0xe8] sm:$0xff]  ;;  %v428_v7 = vld [vmem:[%s4180_s25 + $0x70] sm:$0xff] }
  0x28   : > { %3684 = vmatpush3.msra.mxu0 %v404_v8  ;;  %3740 = vmatpush3.msra.mxu1 %v404_v8  ;;  %v786_v4 = vmax.f32 %v3074_v0, 0.0  ;;  %v3076_v8 = vld [vmem:[%s4180_s25 + $0xf0] sm:$0xff]  ;;  %v4271_v17 = vld [vmem:[%s5721_s2] ss:$0 sm:$0xff] }
  0x29   : > { %3685 = vmatprep.subr.mxu0 %v403_v9  ;;  %3741 = vmatprep.subr.mxu1 %v403_v9  ;;  %v4276_v18 = vld [vmem:[%s5722_s3] ss:$0 sm:$0xff] }
  0x2a   : > { %3686 = vmatpush3.msra.mxu0 %v403_v9  ;;  %3742 = vmatpush3.msra.mxu1 %v403_v9  ;;  %v443_v9 = vmax.f32 %v427_v5, 0.0 }
  0x2b   : > { %3687 = vmatprep.subr.mxu0 %v402_v10  ;;  %3743 = vmatprep.subr.mxu1 %v402_v10 }
  0x2c   : > { %3688 = vmatpush3.msra.mxu0 %v402_v10  ;;  %3744 = vmatpush3.msra.mxu1 %v402_v10  ;;  %v787_v10 = vmax.f32 %v3075_v6, 0.0 }
  0x2d   : > { %3689 = vmatprep.subr.mxu0 %v401_v11  ;;  %3745 = vmatprep.subr.mxu1 %v401_v11 }
  0x2e   : > { %3690 = vmatpush3.msra.mxu0 %v401_v11  ;;  %3746 = vmatpush3.msra.mxu1 %v401_v11  ;;  %v444_v11 = vmax.f32 %v428_v7, 0.0 }
  0x2f   : > { %3691 = vmatprep.subr.mxu0 %v400_v12  ;;  %3747 = vmatprep.subr.mxu1 %v400_v12 }
  0x30   : > { %3692 = vmatpush3.msra.mxu0 %v400_v12  ;;  %3748 = vmatpush3.msra.mxu1 %v400_v12  ;;  %v788_v12 = vmax.f32 %v3076_v8, 0.0 }
  0x31   : > { %3693 = vmatprep.subr.mxu0 %v399_v13  ;;  %3749 = vmatprep.subr.mxu1 %v399_v13 }
  0x32   : > { %3694 = vmatpush3.msra.mxu0 %v399_v13  ;;  %3750 = vmatpush3.msra.mxu1 %v399_v13  ;;  %v429_v13 = vld [vmem:[%s4180_s25 + $0x78] sm:$0xff] }
  0x33   : > { %3695 = vmatprep.subr.mxu0 %v398_v14  ;;  %3751 = vmatprep.subr.mxu1 %v398_v14  ;;  %v445_v15 = vmax.f32 %v429_v13, 0.0 }
  0x34   : > { %3696 = vmatpush3.msra.mxu0 %v398_v14  ;;  %3752 = vmatpush3.msra.mxu1 %v398_v14  ;;  %v3077_v14 = vld [vmem:[%s4180_s25 + $0xf8] sm:$0xff] }
  0x35   : > { %3697 = vmatprep.subr.mxu0 %v397_v16  ;;  %3753 = vmatprep.subr.mxu1 %v397_v16 }
  0x36   : > { %3698 = vmatpush3.msra.mxu0 %v397_v16  ;;  %3754 = vmatpush3.msra.mxu1 %v397_v16  ;;  %v789_v16 = vmax.f32 %v3077_v14, 0.0 }
  0x37   : > { %3699 = vmatprep.subr.mxu0 %v396_v20  ;;  %3755 = vmatprep.subr.mxu1 %v396_v20 }
  0x38   : > { %3700 = vmatpush3.msra.mxu0 %v396_v20  ;;  %3701 = vmatprep.mubr.f32.mxu0 %v430_v21 }
  0x39   : > { %3756 = vmatpush3.msra.mxu1 %v396_v20  ;;  %3757 = vmatprep.mubr.f32.mxu1 %v774_v24 }
  0x3a   : > { %3702 = vmatmul.mubr.f32.vlgmr.msra.gmra.mxu0 %v431_v25  ;;  %3758 = vmatmul.mubr.f32.vlgmr.msra.gmra.mxu1 %v775_v26 }
  0x3b   : > { %3704 = vmatprep.mubr.f32.mxu0 %v432_v27  ;;  %3760 = vmatprep.mubr.f32.mxu1 %v776_v28 }
  0x3e   : > { %3705 = vmatmul.mubr.f32.gmra.mxu0 %v433_v33  ;;  %3761 = vmatmul.mubr.f32.gmra.mxu1 %v777_v34 }
  0x3f   : > { %3707 = vmatprep.mubr.f32.mxu0 %v434_v35  ;;  %3763 = vmatprep.mubr.f32.mxu1 %v778_v36 }
  0x42   : > { %3708 = vmatmul.mubr.f32.gmra.mxu0 %v435_v41  ;;  %3764 = vmatmul.mubr.f32.gmra.mxu1 %v779_v42 }
  0x43   : > { %3710 = vmatprep.mubr.f32.mxu0 %v436_v43  ;;  %3766 = vmatprep.mubr.f32.mxu1 %v780_v44 }
  0x46   : > { %3711 = vmatmul.mubr.f32.gmra.mxu0 %v437_v49  ;;  %3767 = vmatmul.mubr.f32.gmra.mxu1 %v781_v50 }
  0x47   : > { %3713 = vmatprep.mubr.f32.mxu0 %v438_v51  ;;  %3769 = vmatprep.mubr.f32.mxu1 %v782_v52 }
  0x4a   : > { %3714 = vmatmul.mubr.f32.gmra.mxu0 %v439_v57  ;;  %3770 = vmatmul.mubr.f32.gmra.mxu1 %v783_v58 }
  0x4b   : > { %3716 = vmatprep.mubr.f32.mxu0 %v440_v59  ;;  %3772 = vmatprep.mubr.f32.mxu1 %v784_v60 }
  0x4e   : > { %3717 = vmatmul.mubr.f32.gmra.mxu0 %v441_v1  ;;  %3773 = vmatmul.mubr.f32.gmra.mxu1 %v785_v2 }
  0x4f   : > { %3719 = vmatprep.mubr.f32.mxu0 %v442_v3  ;;  %3775 = vmatprep.mubr.f32.mxu1 %v786_v4 }
  0x52   : > { %3720 = vmatmul.mubr.f32.gmra.mxu0 %v443_v9  ;;  %3776 = vmatmul.mubr.f32.gmra.mxu1 %v787_v10 }
  0x53   : > { %3722 = vmatprep.mubr.f32.mxu0 %v444_v11  ;;  %3778 = vmatprep.mubr.f32.mxu1 %v788_v12 }
  0x56   : > { %3723 = vmatmul.mubr.f32.gmra.mxu0 %v445_v15  ;;  %3779 = vmatmul.mubr.f32.gmra.mxu1 %v789_v16 }
  0xfa   : > { %v3703_v19 = vpop.f32.mrf.mxu0  ;;  %v3759_v20 = vpop.f32.mrf.mxu1 }
  0xfb   : > { %v598_v21 = vmul.f32 %v3703_v19, %v4271_v17  ;;  %v936_v22 = vmul.f32 %v3759_v20, %v4271_v17 }
  0xfc   : > { %v512_v23 = vpop.f32.mrf.mxu0  ;;  %v856_v24 = vpop.f32.mrf.mxu1 }
  0xfd   : > { %v620_v25 = vadd.f32 %v4276_v18, %v598_v21  ;;  %v952_v26 = vadd.f32 %v4276_v18, %v936_v22  ;;  %v597_v27 = vmul.f32 %v4271_v17, %v512_v23  ;;  %v935_v28 = vmul.f32 %v4271_v17, %v856_v24 }
  0xfe   : > { %v3706_v29 = vpop.f32.mrf.mxu0  ;;  %v3762_v30 = vpop.f32.mrf.mxu1 }
  0xff   : > { %v636_v31 = vmax.f32 %v620_v25, 0.0  ;;  %v968_v32 = vmax.f32 %v952_v26, 0.0  ;;  %v619_v33 = vadd.f32 %v4276_v18, %v597_v27  ;;  %v951_v34 = vadd.f32 %v4276_v18, %v935_v28 }
 0x100   : > { %v600_v35 = vmul.f32 %v3706_v29, %v4271_v17  ;;  %v938_v36 = vmul.f32 %v3762_v30, %v4271_v17  ;;  %v522_v37 = vpop.f32.mrf.mxu0  ;;  %v866_v38 = vpop.f32.mrf.mxu1 }
 0x101   : > { %v669_v39 = vrot.slane %v636_v31, 7  ;;  %v1000_v40 = vrot.slane %v968_v32, 7  ;;  %v635_v41 = vmax.f32 %v619_v33, 0.0  ;;  %v967_v42 = vmax.f32 %v951_v34, 0.0 }
 0x102   : > { %v622_v43 = vadd.f32 %v4276_v18, %v600_v35  ;;  %v954_v44 = vadd.f32 %v4276_v18, %v938_v36  ;;  %v599_v45 = vmul.f32 %v4271_v17, %v522_v37  ;;  %v937_v46 = vmul.f32 %v4271_v17, %v866_v38  ;;  %v3709_v47 = vpop.f32.mrf.mxu0  ;;  %v3765_v48 = vpop.f32.mrf.mxu1 }
 0x103   : > { %v724_v49 = vsel %vm667_vm0, %v669_v39, 0.0  ;;  %v1055_v50 = vsel %vm667_vm0, %v1000_v40, 0.0  ;;  %v668_v51 = vrot.slane %v635_v41, 7  ;;  %v999_v52 = vrot.slane %v967_v42, 7 }
 0x104   : > { %735 = vst [vmem:[#allocation2 + $0x28] sm:$0x3] %v724_v49  ;;  %1066 = vst [vmem:[#allocation2 + $0xe8] sm:$0x3] %v1055_v50  ;;  %v638_v53 = vmax.f32 %v622_v43, 0.0  ;;  %v970_v54 = vmax.f32 %v954_v44, 0.0  ;;  %v621_v55 = vadd.f32 %v4276_v18, %v599_v45  ;;  %v953_v56 = vadd.f32 %v4276_v18, %v937_v46  ;;  %v532_v57 = vpop.f32.mrf.mxu0  ;;  %v876_v58 = vpop.f32.mrf.mxu1 }
 0x105   : > { %v670_v59 = vsel %vm667_vm0, %v668_v51, %v669_v39  ;;  %v716_v60 = vsel %vm667_vm0, 0.0, %v668_v51  ;;  %v1001_v61 = vsel %vm667_vm0, %v999_v52, %v1000_v40  ;;  %v1047_v62 = vsel %vm667_vm0, 0.0, %v999_v52 }
 0x106   : > { %733 = vst [vmem:[#allocation2 + $0x18] sm:$0xff] %v716_v60  ;;  %734 = vst [vmem:[#allocation2 + $0x20] sm:$0xff] %v670_v59  ;;  %v672_v63 = vrot.slane %v638_v53, 7  ;;  %v1003_v0 = vrot.slane %v970_v54, 7  ;;  %v637_v1 = vmax.f32 %v621_v55, 0.0  ;;  %v969_v2 = vmax.f32 %v953_v56, 0.0  ;;  %v3712_v3 = vpop.f32.mrf.mxu0  ;;  %v3768_v4 = vpop.f32.mrf.mxu1 }
 0x107   : > { %1064 = vst [vmem:[#allocation2 + $0xd8] sm:$0xff] %v1047_v62  ;;  %1065 = vst [vmem:[#allocation2 + $0xe0] sm:$0xff] %v1001_v61  ;;  %v602_v5 = vmul.f32 %v3709_v47, %v4271_v17  ;;  %v940_v6 = vmul.f32 %v3765_v48, %v4271_v17  ;;  %v601_v7 = vmul.f32 %v4271_v17, %v532_v57 }
 0x108   : > { %v939_v8 = vmul.f32 %v4271_v17, %v876_v58  ;;  %v725_v9 = vsel %vm667_vm0, %v672_v63, 0.0  ;;  %v1056_v10 = vsel %vm667_vm0, %v1003_v0, 0.0  ;;  %v671_v11 = vrot.slane %v637_v1, 7  ;;  %v542_v13 = vpop.f32.mrf.mxu0  ;;  %v886_v14 = vpop.f32.mrf.mxu1 }
 0x109   : > { %v1002_v12 = vrot.slane %v969_v2, 7  ;;  %738 = vst [vmem:[#allocation2 + $0x40] sm:$0x3] %v725_v9  ;;  %1069 = vst [vmem:[#allocation2 + $0x100] sm:$0x3] %v1056_v10  ;;  %v624_v15 = vadd.f32 %v4276_v18, %v602_v5  ;;  %v956_v16 = vadd.f32 %v4276_v18, %v940_v6  ;;  %v623_v19 = vadd.f32 %v4276_v18, %v601_v7 }
 0x10a   : > { %v955_v20 = vadd.f32 %v4276_v18, %v939_v8  ;;  %v673_v21 = vsel %vm667_vm0, %v671_v11, %v672_v63  ;;  %v717_v22 = vsel %vm667_vm0, 0.0, %v671_v11  ;;  %v3715_v25 = vpop.f32.mrf.mxu0  ;;  %v3771_v26 = vpop.f32.mrf.mxu1  ;;  %v604_v31 = vmul.f32 %v3712_v3, %v4271_v17 }
 0x10b   : > { %v1004_v23 = vsel %vm667_vm0, %v1002_v12, %v1003_v0  ;;  %v1048_v24 = vsel %vm667_vm0, 0.0, %v1002_v12  ;;  %736 = vst [vmem:[#allocation2 + $0x30] sm:$0xff] %v717_v22  ;;  %737 = vst [vmem:[#allocation2 + $0x38] sm:$0xff] %v673_v21  ;;  %v640_v27 = vmax.f32 %v624_v15, 0.0  ;;  %v972_v28 = vmax.f32 %v956_v16, 0.0 }
 0x10c   : > { %1067 = vst [vmem:[#allocation2 + $0xf0] sm:$0xff] %v1048_v24  ;;  %1068 = vst [vmem:[#allocation2 + $0xf8] sm:$0xff] %v1004_v23  ;;  %v639_v29 = vmax.f32 %v623_v19, 0.0  ;;  %v971_v30 = vmax.f32 %v955_v20, 0.0  ;;  %v942_v32 = vmul.f32 %v3768_v4, %v4271_v17  ;;  %v603_v33 = vmul.f32 %v4271_v17, %v542_v13  ;;  %v552_v35 = vpop.f32.mrf.mxu0  ;;  %v896_v36 = vpop.f32.mrf.mxu1 }
 0x10d   : > { %v941_v34 = vmul.f32 %v4271_v17, %v886_v14  ;;  %v675_v37 = vrot.slane %v640_v27, 7  ;;  %v1006_v38 = vrot.slane %v972_v28, 7  ;;  %v626_v41 = vadd.f32 %v4276_v18, %v604_v31 }
 0x10e   : > { %v674_v39 = vrot.slane %v639_v29, 7  ;;  %v1005_v40 = vrot.slane %v971_v30, 7  ;;  %v958_v42 = vadd.f32 %v4276_v18, %v942_v32  ;;  %v625_v43 = vadd.f32 %v4276_v18, %v603_v33  ;;  %v3718_v45 = vpop.f32.mrf.mxu0  ;;  %v3774_v46 = vpop.f32.mrf.mxu1 }
 0x10f   : > { %v957_v44 = vadd.f32 %v4276_v18, %v941_v34  ;;  %v726_v47 = vsel %vm667_vm0, %v675_v37, 0.0  ;;  %v1057_v48 = vsel %vm667_vm0, %v1006_v38, 0.0  ;;  %v642_v53 = vmax.f32 %v626_v41, 0.0 }
 0x110   : > { %v676_v49 = vsel %vm667_vm0, %v674_v39, %v675_v37  ;;  %v718_v50 = vsel %vm667_vm0, 0.0, %v674_v39  ;;  %741 = vst [vmem:[#allocation2 + $0x58] sm:$0x3] %v726_v47  ;;  %1072 = vst [vmem:[#allocation2 + $0x118] sm:$0x3] %v1057_v48  ;;  %v1007_v51 = vsel %vm667_vm0, %v1005_v40, %v1006_v38  ;;  %v1049_v52 = vsel %vm667_vm0, 0.0, %v1005_v40  ;;  %v562_v55 = vpop.f32.mrf.mxu0  ;;  %v906_v56 = vpop.f32.mrf.mxu1 }
 0x111   : > { %739 = vst [vmem:[#allocation2 + $0x48] sm:$0xff] %v718_v50  ;;  %740 = vst [vmem:[#allocation2 + $0x50] sm:$0xff] %v676_v49  ;;  %v974_v54 = vmax.f32 %v958_v42, 0.0  ;;  %v641_v57 = vmax.f32 %v625_v43, 0.0  ;;  %v973_v58 = vmax.f32 %v957_v44, 0.0  ;;  %v606_v59 = vmul.f32 %v3715_v25, %v4271_v17 }
 0x112   : > { %1070 = vst [vmem:[#allocation2 + $0x108] sm:$0xff] %v1049_v52  ;;  %1071 = vst [vmem:[#allocation2 + $0x110] sm:$0xff] %v1007_v51  ;;  %v944_v60 = vmul.f32 %v3771_v26, %v4271_v17  ;;  %v678_v61 = vrot.slane %v642_v53, 7  ;;  %v605_v63 = vmul.f32 %v4271_v17, %v552_v35  ;;  %v943_v0 = vmul.f32 %v4271_v17, %v896_v36  ;;  %v3721_v5 = vpop.f32.mrf.mxu0  ;;  %v3777_v6 = vpop.f32.mrf.mxu1 }
 0x113   : > { %v1009_v62 = vrot.slane %v974_v54, 7  ;;  %v677_v1 = vrot.slane %v641_v57, 7  ;;  %v1008_v2 = vrot.slane %v973_v58, 7  ;;  %v628_v3 = vadd.f32 %v4276_v18, %v606_v59 }
 0x114   : > { %v960_v4 = vadd.f32 %v4276_v18, %v944_v60  ;;  %v727_v7 = vsel %vm667_vm0, %v678_v61, 0.0  ;;  %v627_v9 = vadd.f32 %v4276_v18, %v605_v63  ;;  %v959_v10 = vadd.f32 %v4276_v18, %v943_v0  ;;  %v572_v25 = vpop.f32.mrf.mxu0  ;;  %v916_v26 = vpop.f32.mrf.mxu1 }
 0x115   : > { %v1058_v8 = vsel %vm667_vm0, %v1009_v62, 0.0  ;;  %744 = vst [vmem:[#allocation2 + $0x70] sm:$0x3] %v727_v7  ;;  %v679_v11 = vsel %vm667_vm0, %v677_v1, %v678_v61  ;;  %v719_v12 = vsel %vm667_vm0, 0.0, %v677_v1  ;;  %v1010_v13 = vsel %vm667_vm0, %v1008_v2, %v1009_v62 }
 0x116   : > { %1075 = vst [vmem:[#allocation2 + $0x130] sm:$0x3] %v1058_v8  ;;  %v1050_v14 = vsel %vm667_vm0, 0.0, %v1008_v2  ;;  %742 = vst [vmem:[#allocation2 + $0x60] sm:$0xff] %v719_v12  ;;  %v644_v15 = vmax.f32 %v628_v3, 0.0  ;;  %v976_v16 = vmax.f32 %v960_v4, 0.0  ;;  %v608_v21 = vmul.f32 %v3718_v45, %v4271_v17  ;;  %v3724_v43 = vpop.f32.mrf.mxu0  ;;  %v3780_v44 = vpop.f32.mrf.mxu1 }
 0x117   : > { %743 = vst [vmem:[#allocation2 + $0x68] sm:$0xff] %v679_v11  ;;  %1073 = vst [vmem:[#allocation2 + $0x120] sm:$0xff] %v1050_v14  ;;  %v643_v19 = vmax.f32 %v627_v9, 0.0  ;;  %v975_v20 = vmax.f32 %v959_v10, 0.0  ;;  %v946_v22 = vmul.f32 %v3774_v46, %v4271_v17  ;;  %v607_v23 = vmul.f32 %v4271_v17, %v562_v55 }
 0x118   : > { %1074 = vst [vmem:[#allocation2 + $0x128] sm:$0xff] %v1010_v13  ;;  %v945_v24 = vmul.f32 %v4271_v17, %v906_v56  ;;  %v681_v27 = vrot.slane %v644_v15, 7  ;;  %v1012_v28 = vrot.slane %v976_v16, 7  ;;  %v630_v31 = vadd.f32 %v4276_v18, %v608_v21  ;;  %v582_v61 = vpop.f32.mrf.mxu0  ;;  %v926_v62 = vpop.f32.mrf.mxu1 }
 0x119   : > { %v680_v29 = vrot.slane %v643_v19, 7  ;;  %v1011_v30 = vrot.slane %v975_v20, 7  ;;  %v962_v32 = vadd.f32 %v4276_v18, %v946_v22  ;;  %v629_v33 = vadd.f32 %v4276_v18, %v607_v23 }
 0x11a   : > { %v961_v34 = vadd.f32 %v4276_v18, %v945_v24  ;;  %v728_v35 = vsel %vm667_vm0, %v681_v27, 0.0  ;;  %v1059_v36 = vsel %vm667_vm0, %v1012_v28, 0.0  ;;  %v646_v41 = vmax.f32 %v630_v31, 0.0 }
 0x11b   : > { %v682_v37 = vsel %vm667_vm0, %v680_v29, %v681_v27  ;;  %v720_v38 = vsel %vm667_vm0, 0.0, %v680_v29  ;;  %747 = vst [vmem:[#allocation2 + $0x88] sm:$0x3] %v728_v35  ;;  %1078 = vst [vmem:[#allocation2 + $0x148] sm:$0x3] %v1059_v36  ;;  %v1013_v39 = vsel %vm667_vm0, %v1011_v30, %v1012_v28  ;;  %v1051_v40 = vsel %vm667_vm0, 0.0, %v1011_v30 }
 0x11c   : > { %745 = vst [vmem:[#allocation2 + $0x78] sm:$0xff] %v720_v38  ;;  %746 = vst [vmem:[#allocation2 + $0x80] sm:$0xff] %v682_v37  ;;  %v978_v42 = vmax.f32 %v962_v32, 0.0  ;;  %v645_v45 = vmax.f32 %v629_v33, 0.0  ;;  %v977_v46 = vmax.f32 %v961_v34, 0.0  ;;  %v610_v47 = vmul.f32 %v3721_v5, %v4271_v17 }
 0x11d   : > { %1076 = vst [vmem:[#allocation2 + $0x138] sm:$0xff] %v1051_v40  ;;  %1077 = vst [vmem:[#allocation2 + $0x140] sm:$0xff] %v1013_v39  ;;  %v948_v48 = vmul.f32 %v3777_v6, %v4271_v17  ;;  %v684_v49 = vrot.slane %v646_v41, 7  ;;  %v609_v51 = vmul.f32 %v4271_v17, %v572_v25  ;;  %v947_v52 = vmul.f32 %v4271_v17, %v916_v26 }
 0x11e   : > { %v1015_v50 = vrot.slane %v978_v42, 7  ;;  %v683_v53 = vrot.slane %v645_v45, 7  ;;  %v1014_v54 = vrot.slane %v977_v46, 7  ;;  %v632_v55 = vadd.f32 %v4276_v18, %v610_v47 }
 0x11f   : > { %v964_v56 = vadd.f32 %v4276_v18, %v948_v48  ;;  %v729_v57 = vsel %vm667_vm0, %v684_v49, 0.0  ;;  %v631_v59 = vadd.f32 %v4276_v18, %v609_v51  ;;  %v963_v60 = vadd.f32 %v4276_v18, %v947_v52 }
 0x120   : > { %v1060_v58 = vsel %vm667_vm0, %v1015_v50, 0.0  ;;  %750 = vst [vmem:[#allocation2 + $0xa0] sm:$0x3] %v729_v57  ;;  %v685_v63 = vsel %vm667_vm0, %v683_v53, %v684_v49  ;;  %v721_v0 = vsel %vm667_vm0, 0.0, %v683_v53  ;;  %v1016_v1 = vsel %vm667_vm0, %v1014_v54, %v1015_v50 }
 0x121   : > { %1081 = vst [vmem:[#allocation2 + $0x160] sm:$0x3] %v1060_v58  ;;  %v1052_v2 = vsel %vm667_vm0, 0.0, %v1014_v54  ;;  %748 = vst [vmem:[#allocation2 + $0x90] sm:$0xff] %v721_v0  ;;  %v648_v3 = vmax.f32 %v632_v55, 0.0  ;;  %v980_v4 = vmax.f32 %v964_v56, 0.0  ;;  %v612_v7 = vmul.f32 %v3724_v43, %v4271_v17 }
 0x122   : > { %749 = vst [vmem:[#allocation2 + $0x98] sm:$0xff] %v685_v63  ;;  %1079 = vst [vmem:[#allocation2 + $0x150] sm:$0xff] %v1052_v2  ;;  %v647_v5 = vmax.f32 %v631_v59, 0.0  ;;  %v979_v6 = vmax.f32 %v963_v60, 0.0  ;;  %v950_v8 = vmul.f32 %v3780_v44, %v4271_v17  ;;  %v611_v9 = vmul.f32 %v4271_v17, %v582_v61 }
 0x123   : > { %1080 = vst [vmem:[#allocation2 + $0x158] sm:$0xff] %v1016_v1  ;;  %v949_v10 = vmul.f32 %v4271_v17, %v926_v62  ;;  %v687_v11 = vrot.slane %v648_v3, 7  ;;  %v1018_v12 = vrot.slane %v980_v4, 7  ;;  %v634_v15 = vadd.f32 %v4276_v18, %v612_v7 }
 0x124   : > { %v686_v13 = vrot.slane %v647_v5, 7  ;;  %v1017_v14 = vrot.slane %v979_v6, 7  ;;  %v966_v16 = vadd.f32 %v4276_v18, %v950_v8  ;;  %v633_v19 = vadd.f32 %v4276_v18, %v611_v9 }
 0x125   : > { %v965_v20 = vadd.f32 %v4276_v18, %v949_v10  ;;  %v730_v21 = vsel %vm667_vm0, %v687_v11, 0.0  ;;  %v1061_v22 = vsel %vm667_vm0, %v1018_v12, 0.0  ;;  %v650_v26 = vmax.f32 %v634_v15, 0.0 }
 0x126   : > { %v688_v23 = vsel %vm667_vm0, %v686_v13, %v687_v11  ;;  %v722_v17 = vsel %vm667_vm0, 0.0, %v686_v13  ;;  %753 = vst [vmem:[#allocation2 + $0xb8] sm:$0x3] %v730_v21  ;;  %1084 = vst [vmem:[#allocation2 + $0x178] sm:$0x3] %v1061_v22  ;;  %v1019_v24 = vsel %vm667_vm0, %v1017_v14, %v1018_v12  ;;  %v1053_v25 = vsel %vm667_vm0, 0.0, %v1017_v14 }
 0x127   : > { %751 = vst [vmem:[#allocation2 + $0xa8] sm:$0xff] %v722_v17  ;;  %752 = vst [vmem:[#allocation2 + $0xb0] sm:$0xff] %v688_v23  ;;  %v982_v27 = vmax.f32 %v966_v16, 0.0  ;;  %v649_v18 = vmax.f32 %v633_v19, 0.0  ;;  %v981_v28 = vmax.f32 %v965_v20, 0.0  ;;  %v690_v29 = vrot.slane %v650_v26, 7 }
 0x128   : > { %1082 = vst [vmem:[#allocation2 + $0x168] sm:$0xff] %v1053_v25  ;;  %1083 = vst [vmem:[#allocation2 + $0x170] sm:$0xff] %v1019_v24 }
 0x129   : > { %v1021_v30 = vrot.slane %v982_v27, 7  ;;  %v689_v31 = vrot.slane %v649_v18, 7  ;;  %v1020_v32 = vrot.slane %v981_v28, 7  ;;  %v731_v33 = vsel %vm667_vm0, %v690_v29, 0.0 }
 0x12a   : > { %756 = vst [vmem:[#allocation2 + $0xd0] sm:$0x3] %v731_v33 }
 0x12b   : > { %v1062_v34 = vsel %vm667_vm0, %v1021_v30, 0.0  ;;  %v691_v35 = vsel %vm667_vm0, %v689_v31, %v690_v29  ;;  %v723_v36 = vsel %vm667_vm0, 0.0, %v689_v31  ;;  %v1022_v37 = vsel %vm667_vm0, %v1020_v32, %v1021_v30 }
 0x12c   : > { %1087 = vst [vmem:[#allocation2 + $0x190] sm:$0x3] %v1062_v34  ;;  %v1054_v38 = vsel %vm667_vm0, 0.0, %v1020_v32  ;;  %754 = vst [vmem:[#allocation2 + $0xc0] sm:$0xff] %v723_v36 }
 0x12d   : > { %755 = vst [vmem:[#allocation2 + $0xc8] sm:$0xff] %v691_v35  ;;  %1085 = vst [vmem:[#allocation2 + $0x180] sm:$0xff] %v1054_v38 }
 0x12e   : > { %1086 = vst [vmem:[#allocation2 + $0x188] sm:$0xff] %v1022_v37 }
 0x12f PF: > { %v3137_v39 = vld [vmem:[%s5723_s4 + $0x278] sm:$0xff]  ;;  %v3136_v42 = vld [vmem:[%s5723_s4 + $0x270] sm:$0xff]  ;;  %v3135_v45 = vld [vmem:[%s5723_s4 + $0x268] sm:$0xff]  ;;  %s3079_s18 = smul.u32 192, %s4070_s13  ;;  %vm1139_vm1 = vcmask 1046528   ;;  %vm1196_vm2 = vcmask 1045504  }
 0x130   : > { %v3153_v40 = vld [vmem:[%s5723_s4 + $0x2f8] sm:$0xff]  ;;  %3301 = vmatprep.subr.mxu0 %v3137_v39  ;;  %v3152_v43 = vld [vmem:[%s5723_s4 + $0x2f0] sm:$0xff]  ;;  %v3151_v46 = vld [vmem:[%s5723_s4 + $0x2e8] sm:$0xff]  ;;  %s3236_s29 = sshll.u32 %s4070_s13, 7 }
 0x131   : > { %v3121_v41 = vld [vmem:[%s5723_s4 + $0x1f8] sm:$0xff]  ;;  %3781 = vmatprep.subr.mxu1 %v3153_v40  ;;  %v3120_v44 = vld [vmem:[%s5723_s4 + $0x1f0] sm:$0xff]  ;;  %v3119_v47 = vld [vmem:[%s5723_s4 + $0x1e8] sm:$0xff]  ;;  %s4505_s12 = scalar_lea.vmem [#allocation2], %s3079_s18  ;;  %s5628_s30 = scalar_lea.vmem %s4180_s25, %s3236_s29 }
 0x132   : > { %3302 = vmatpush3.msra.mxu0 %v3121_v41  ;;  %3782 = vmatpush3.msra.mxu1 %v3153_v40  ;;  %v3134_v48 = vld [vmem:[%s5723_s4 + $0x260] sm:$0xff]  ;;  %v3133_v51 = vld [vmem:[%s5723_s4 + $0x258] sm:$0xff]  ;;  %v3132_v54 = vld [vmem:[%s5723_s4 + $0x250] sm:$0xff] }
 0x133   : > { %3303 = vmatprep.subr.mxu0 %v3136_v42  ;;  %3783 = vmatprep.subr.mxu1 %v3152_v43  ;;  %v3150_v49 = vld [vmem:[%s5723_s4 + $0x2e0] sm:$0xff]  ;;  %v3149_v52 = vld [vmem:[%s5723_s4 + $0x2d8] sm:$0xff]  ;;  %v3148_v55 = vld [vmem:[%s5723_s4 + $0x2d0] sm:$0xff] }
 0x134   : > { %3304 = vmatpush3.msra.mxu0 %v3120_v44  ;;  %3784 = vmatpush3.msra.mxu1 %v3152_v43  ;;  %v3118_v50 = vld [vmem:[%s5723_s4 + $0x1e0] sm:$0xff]  ;;  %v3117_v53 = vld [vmem:[%s5723_s4 + $0x1d8] sm:$0xff]  ;;  %v3116_v56 = vld [vmem:[%s5723_s4 + $0x1d0] sm:$0xff] }
 0x135   : > { %3305 = vmatprep.subr.mxu0 %v3135_v45  ;;  %3785 = vmatprep.subr.mxu1 %v3151_v46  ;;  %v3131_v57 = vld [vmem:[%s5723_s4 + $0x248] sm:$0xff]  ;;  %v3130_v60 = vld [vmem:[%s5723_s4 + $0x240] sm:$0xff]  ;;  %v3129_v63 = vld [vmem:[%s5723_s4 + $0x238] sm:$0xff] }
 0x136   : > { %3306 = vmatpush3.msra.mxu0 %v3119_v47  ;;  %3786 = vmatpush3.msra.mxu1 %v3151_v46  ;;  %v3147_v58 = vld [vmem:[%s5723_s4 + $0x2c8] sm:$0xff]  ;;  %v3146_v61 = vld [vmem:[%s5723_s4 + $0x2c0] sm:$0xff]  ;;  %v3145_v0 = vld [vmem:[%s5723_s4 + $0x2b8] sm:$0xff] }
 0x137   : > { %3307 = vmatprep.subr.mxu0 %v3134_v48  ;;  %3787 = vmatprep.subr.mxu1 %v3150_v49  ;;  %v3115_v59 = vld [vmem:[%s5723_s4 + $0x1c8] sm:$0xff]  ;;  %v3114_v62 = vld [vmem:[%s5723_s4 + $0x1c0] sm:$0xff]  ;;  %v3113_v1 = vld [vmem:[%s5723_s4 + $0x1b8] sm:$0xff] }
 0x138   : > { %3308 = vmatpush3.msra.mxu0 %v3118_v50  ;;  %3788 = vmatpush3.msra.mxu1 %v3150_v49  ;;  %v3128_v2 = vld [vmem:[%s5723_s4 + $0x230] sm:$0xff]  ;;  %v3127_v5 = vld [vmem:[%s5723_s4 + $0x228] sm:$0xff]  ;;  %v3126_v8 = vld [vmem:[%s5723_s4 + $0x220] sm:$0xff] }
 0x139   : > { %3309 = vmatprep.subr.mxu0 %v3133_v51  ;;  %3789 = vmatprep.subr.mxu1 %v3149_v52  ;;  %v3144_v3 = vld [vmem:[%s5723_s4 + $0x2b0] sm:$0xff]  ;;  %v3143_v6 = vld [vmem:[%s5723_s4 + $0x2a8] sm:$0xff]  ;;  %v3142_v9 = vld [vmem:[%s5723_s4 + $0x2a0] sm:$0xff] }
 0x13a   : > { %3310 = vmatpush3.msra.mxu0 %v3117_v53  ;;  %3790 = vmatpush3.msra.mxu1 %v3149_v52  ;;  %v3112_v4 = vld [vmem:[%s5723_s4 + $0x1b0] sm:$0xff]  ;;  %v3111_v7 = vld [vmem:[%s5723_s4 + $0x1a8] sm:$0xff]  ;;  %v3110_v10 = vld [vmem:[%s5723_s4 + $0x1a0] sm:$0xff] }
 0x13b   : > { %3311 = vmatprep.subr.mxu0 %v3132_v54  ;;  %3791 = vmatprep.subr.mxu1 %v3148_v55  ;;  %v3125_v11 = vld [vmem:[%s5723_s4 + $0x218] sm:$0xff]  ;;  %v4511_v14 = vld [vmem:[%s4505_s12 + $0x20] sm:$0xff]  ;;  %v3124_v16 = vld [vmem:[%s5723_s4 + $0x210] sm:$0xff] }
 0x13c   : > { %3312 = vmatpush3.msra.mxu0 %v3116_v56  ;;  %3792 = vmatpush3.msra.mxu1 %v3148_v55  ;;  %v3141_v12 = vld [vmem:[%s5723_s4 + $0x298] sm:$0xff]  ;;  %v3140_v19 = vld [vmem:[%s5723_s4 + $0x290] sm:$0xff]  ;;  %v3084_v20 = vld [vmem:[%s4505_s12 + $0x28] sm:$0x3]  ;;  %v4528_v23 = vrot.slane %v4511_v14, 1  ;;  %v4538_v26 = vrot.slane %v4511_v14, 2 }
 0x13d   : > { %3313 = vmatprep.subr.mxu0 %v3131_v57  ;;  %3793 = vmatprep.subr.mxu1 %v3147_v58  ;;  %v4508_v13 = vld [vmem:[%s4505_s12 + $0x18] sm:$0xff]  ;;  %v3108_v21 = vld [vmem:[%s5723_s4 + $0x190] sm:$0xff]  ;;  %v3123_v17 = vld [vmem:[%s5723_s4 + $0x208] sm:$0xff]  ;;  %v1411_v28 = vrot.slane %v3084_v20, 2  ;;  %v1355_v36 = vrot.slane %v3084_v20, 1 }
 0x13e   : > { %3314 = vmatpush3.msra.mxu0 %v3115_v59  ;;  %3794 = vmatpush3.msra.mxu1 %v3147_v58  ;;  %v3109_v15 = vld [vmem:[%s5723_s4 + $0x198] sm:$0xff]  ;;  %v1352_v22 = vrot.slane %v4508_v13, 1  ;;  %v3139_v24 = vld [vmem:[%s5723_s4 + $0x288] sm:$0xff]  ;;  %v1408_v25 = vrot.slane %v4508_v13, 2  ;;  %v3122_v18 = vld [vmem:[%s5723_s4 + $0x200] sm:$0xff] }
 0x13f   : > { %3315 = vmatprep.subr.mxu0 %v3130_v60  ;;  %3795 = vmatprep.subr.mxu1 %v3146_v61  ;;  %v3107_v27 = vld [vmem:[%s5723_s4 + $0x188] sm:$0xff]  ;;  %v3138_v29 = vld [vmem:[%s5723_s4 + $0x280] sm:$0xff]  ;;  %v4550_v30 = vld [vmem:[%s4505_s12 + $0x30] sm:$0xff]  ;;  %v1412_v37 = vsel %vm1196_vm2, %v4538_v26, %v1411_v28  ;;  %v1356_v47 = vsel %vm1139_vm1, %v4528_v23, %v1355_v36 }
 0x140   : > { %3316 = vmatpush3.msra.mxu0 %v3114_v62  ;;  %3796 = vmatpush3.msra.mxu1 %v3146_v61  ;;  %v4553_v31 = vld [vmem:[%s4505_s12 + $0x38] sm:$0xff]  ;;  %v3106_v32 = vld [vmem:[%s5723_s4 + $0x180] sm:$0xff]  ;;  %v4560_v33 = vsel %vm1139_vm1, %v1352_v22, %v4528_v23  ;;  %v4567_v35 = vsel %vm1196_vm2, %v1408_v25, %v4538_v26  ;;  %v1413_v38 = vrot.slane %v4550_v30, 2  ;;  %v4588_v44 = vld [vmem:[%s4505_s12 + $0x48] sm:$0xff]  ;;  %v1357_v51 = vrot.slane %v4550_v30, 1 }
 0x141   : > { %3317 = vmatprep.subr.mxu0 %v3129_v63  ;;  %3797 = vmatprep.subr.mxu1 %v3145_v0  ;;  %v4563_v34 = vld [vmem:[%s4505_s12 + $0x40] sm:$0x3]  ;;  %5749 = vst [vmem:[#allocation5_spill] sm:$0xff] %v4567_v35  ;;  %v4573_v39 = vrot.slane %v4553_v31, 2  ;;  %v1284_v40 = vld [vmem:[%s5723_s4 + $0xf8] sm:$0xff]  ;;  %v4591_v45 = vld [vmem:[%s4505_s12 + $0x50] sm:$0xff] }
 0x142   : > { %3318 = vmatpush3.msra.mxu0 %v3113_v1  ;;  %3798 = vmatpush3.msra.mxu1 %v3145_v0  ;;  %v1300_v41 = vld [vmem:[%s5723_s4 + $0x178] sm:$0xff]  ;;  %v1416_v42 = vrot.slane %v4563_v34, 2  ;;  %5750 = vst [vmem:[#allocation6_spill] sm:$0xff] %v4591_v45  ;;  %v1283_v46 = vld [vmem:[%s5723_s4 + $0xf0] sm:$0xff]  ;;  %v4611_v52 = vrot.slane %v4553_v31, 1  ;;  %v1418_v54 = vrot.slane %v4588_v44, 2 }
 0x143   : > { %3319 = vmatprep.subr.mxu0 %v3128_v2  ;;  %3799 = vmatprep.subr.mxu1 %v3144_v3  ;;  %v1268_v43 = vld [vmem:[%s5723_s4 + $0x78] sm:$0xff]  ;;  %v4604_v49 = vsel %vm1196_vm2, %v1413_v38, %v4573_v39  ;;  %v1267_v50 = vld [vmem:[%s5723_s4 + $0x70] sm:$0xff]  ;;  %v4617_v55 = vrot.slane %v4591_v45, 2  ;;  %v4620_v56 = vld [vmem:[%s4505_s12 + $0x60] sm:$0xff]  ;;  %v1360_v0 = vrot.slane %v4563_v34, 1 }
 0x144   : > { %3320 = vmatpush3.msra.mxu0 %v3112_v4  ;;  %3800 = vmatpush3.msra.mxu1 %v3144_v3  ;;  %v4600_v48 = vld [vmem:[%s4505_s12 + $0x58] sm:$0x3]  ;;  %5751 = vst [vmem:[#allocation7_spill] sm:$0xff] %v4604_v49  ;;  %v1417_v53 = vsel %vm1196_vm2, %v4573_v39, %v1416_v42  ;;  %v4623_v57 = vld [vmem:[%s4505_s12 + $0x68] sm:$0xff]  ;;  %v1299_v59 = vld [vmem:[%s5723_s4 + $0x170] sm:$0xff]  ;;  %v4642_v63 = vsel %vm1139_vm1, %v1357_v51, %v4611_v52  ;;  %v1423_v1 = vrot.slane %v4620_v56, 2 }
 0x145   : > { %3321 = vmatprep.subr.mxu0 %v3127_v5  ;;  %3801 = vmatprep.subr.mxu1 %v3143_v6  ;;  %v1282_v58 = vld [vmem:[%s5723_s4 + $0xe8] sm:$0xff]  ;;  %v1421_v60 = vrot.slane %v4600_v48, 2  ;;  %v1281_v62 = vld [vmem:[%s5723_s4 + $0xe0] sm:$0xff]  ;;  %v4647_v2 = vrot.slane %v4623_v57, 2  ;;  %v4650_v3 = vld [vmem:[%s4505_s12 + $0x70] sm:$0x3]  ;;  %v4654_v4 = vsel %vm1196_vm2, %v1418_v54, %v4617_v55 }
 0x146   : > { %3322 = vmatpush3.msra.mxu0 %v3111_v7  ;;  %3802 = vmatpush3.msra.mxu1 %v3143_v6  ;;  %v1266_v61 = vld [vmem:[%s5723_s4 + $0x68] sm:$0xff]  ;;  %5752 = vst [vmem:[#allocation8_spill] sm:$0xff] %v4654_v4  ;;  %v1265_v5 = vld [vmem:[%s5723_s4 + $0x60] sm:$0xff]  ;;  %v1280_v6 = vld [vmem:[%s5723_s4 + $0xd8] sm:$0xff]  ;;  %v4708_v36 = vrot.slane %v4623_v57, 1 }
 0x147   : > { %3323 = vmatprep.subr.mxu0 %v3126_v8  ;;  %3803 = vmatprep.subr.mxu1 %v3142_v9  ;;  %v1298_v7 = vld [vmem:[%s5723_s4 + $0x168] sm:$0xff]  ;;  %v1362_v8 = vrot.slane %v4588_v44, 1  ;;  %v4684_v20 = vld [vmem:[%s4505_s12 + $0x80] sm:$0xff]  ;;  %v4695_v25 = vsel %vm1196_vm2, %v1423_v1, %v4647_v2 }
 0x148   : > { %3324 = vmatpush3.msra.mxu0 %v3110_v10  ;;  %3804 = vmatpush3.msra.mxu1 %v3142_v9  ;;  %v1422_v9 = vsel %vm1196_vm2, %v4617_v55, %v1421_v60  ;;  %v1264_v10 = vld [vmem:[%s5723_s4 + $0x58] sm:$0xff]  ;;  %5753 = vst [vmem:[#allocation9_spill] sm:$0xff] %v4695_v25  ;;  %v1297_v54 = vld [vmem:[%s5723_s4 + $0x160] sm:$0xff]  ;;  %v1365_v60 = vrot.slane %v4600_v48, 1  ;;  %v4773_v48 = vrot.slane %v4684_v20, 1 }
 0x149   : > { %3325 = vmatprep.subr.mxu0 %v3125_v11  ;;  %3805 = vmatprep.subr.mxu1 %v3141_v12  ;;  %v4672_v11 = vrot.slane %v4591_v45, 1  ;;  %v1277_v1 = vld [vmem:[%s5723_s4 + $0xc0] sm:$0xff] }
 0x14a   : > { %3326 = vmatpush3.msra.mxu0 %v3109_v15  ;;  %3806 = vmatpush3.msra.mxu1 %v3141_v12  ;;  %v4675_v12 = vld [vmem:[%s4505_s12 + $0x78] sm:$0xff]  ;;  %v4678_v15 = vld [vmem:[%s4505_s12 + $0x28] sm:$0x3] }
 0x14b   : > { %3327 = vmatprep.subr.mxu0 %v3124_v16  ;;  %3807 = vmatprep.subr.mxu1 %v3140_v19  ;;  %v1102_v16 = vld [vmem:[%s4505_s12 + $0x58] sm:$0x3]  ;;  %v1428_v34 = vrot.slane %v4675_v12, 2 }
 0x14c   : > { %3328 = vmatpush3.msra.mxu0 %v3108_v21  ;;  %3808 = vmatpush3.msra.mxu1 %v3140_v19  ;;  %v1426_v19 = vrot.slane %v4650_v3, 2  ;;  %v4687_v21 = vld [vmem:[%s4505_s12 + $0x40] sm:$0x3]  ;;  %v1158_v22 = vrot.slane %v1102_v16, 1 }
 0x14d   : > { %3329 = vmatprep.subr.mxu0 %v3123_v17  ;;  %3809 = vmatprep.subr.mxu1 %v3139_v24  ;;  %v1205_v17 = vrot.slane %v4678_v15, 2  ;;  %v1210_v28 = vrot.slane %v4687_v21, 2 }
 0x14e   : > { %3330 = vmatpush3.msra.mxu0 %v3107_v27  ;;  %3810 = vmatpush3.msra.mxu1 %v3139_v24  ;;  %v1361_v24 = vsel %vm1139_vm1, %v4611_v52, %v1360_v0  ;;  %v4698_v27 = vld [vmem:[%s4505_s12 + $0x88] sm:$0x3] }
 0x14f   : > { %3331 = vmatprep.subr.mxu0 %v3122_v18  ;;  %3811 = vmatprep.subr.mxu1 %v3138_v29  ;;  %v1105_v18 = vld [vmem:[%s4505_s12 + $0x70] sm:$0x3]  ;;  %v4723_v42 = vsel %vm1196_vm2, %v4573_v39, %v1210_v28  ;;  %v1108_v0 = vld [vmem:[%s4505_s12 + $0x88] sm:$0x3] }
 0x150   : > { %3332 = vmatpush3.msra.mxu0 %v3106_v32  ;;  %1577 = vmatprep.mubr.f32.mxu0 %v4560_v33  ;;  %v1279_v32 = vld [vmem:[%s5723_s4 + $0xd0] sm:$0xff]  ;;  %v1163_v38 = vrot.slane %v1105_v18, 1  ;;  %5756 = vst [vmem:[#allocation12_spill] sm:$0xff] %v4723_v42  ;;  %v4798_v28 = vld [vmem:[%s4505_s12 + $0xa8] sm:$0xff] }
 0x151   : > { %3812 = vmatpush3.msra.mxu1 %v3138_v29  ;;  %3813 = vmatprep.mubr.f32.mxu1 %v4567_v35  ;;  %v1215_v29 = vrot.slane %v1102_v16, 2  ;;  %v3164_v42 = vld [vmem:[%s4505_s12 + $0x70] sm:$0x3] }
 0x152   : > { %1578 = vmatmul.mubr.f32.vlgmr.msra.gmra.mxu0 %v4508_v13  ;;  %3814 = vmatmul.mubr.f32.vlgmr.msra.gmra.mxu1 %v1412_v37  ;;  %v4712_v37 = vsel %vm1139_vm1, %v4672_v11, %v1158_v22  ;;  %v4737_v51 = vsel %vm1139_vm1, %v4708_v36, %v1163_v38  ;;  %v1296_v22 = vld [vmem:[%s5723_s4 + $0x158] sm:$0xff]  ;;  %v2213_v35 = vrot.slane %v3164_v42, 2 }
 0x153   : > { %3413 = vmatprep.subr.mxu1 %v1284_v40  ;;  %3837 = vmatprep.subr.mxu0 %v1300_v41  ;;  %5754 = vst [vmem:[#allocation10_spill] sm:$0xff] %v4712_v37  ;;  %v1263_v40 = vld [vmem:[%s5723_s4 + $0x50] sm:$0xff]  ;;  %5758 = vst [vmem:[#allocation14_spill] sm:$0xff] %v4737_v51  ;;  %v2157_v51 = vrot.slane %v3164_v42, 1  ;;  %v3173_v37 = vld [vmem:[%s4505_s12 + $0xb8] sm:$0x3] }
 0x154   : > { %3414 = vmatpush3.msra.mxu1 %v1268_v43  ;;  %3838 = vmatpush3.msra.mxu0 %v1300_v41  ;;  %v4719_v41 = vsel %vm1196_vm2, %v4538_v26, %v1205_v17  ;;  %v4727_v43 = vsel %vm1196_vm2, %v4617_v55, %v1215_v29  ;;  %v4732_v26 = vrot.slane %v4684_v20, 2  ;;  %v1260_v17 = vld [vmem:[%s5723_s4 + $0x38] sm:$0xff]  ;;  %v4801_v29 = vld [vmem:[%s4505_s12 + $0xb0] sm:$0xff]  ;;  %v4946_v42 = vld [vmem:[%s4505_s12] sm:$0xff] }
 0x155   : > { %3415 = vmatprep.subr.mxu1 %v1283_v46  ;;  %1582 = vmatprep.mubr.f32.mxu0 %v1356_v47  ;;  %5755 = vst [vmem:[#allocation11_spill] sm:$0xff] %v4719_v41  ;;  %5757 = vst [vmem:[#allocation13_spill] sm:$0xff] %v4727_v43  ;;  %v1220_v46 = vrot.slane %v1105_v18, 2  ;;  %v1427_v47 = vsel %vm1196_vm2, %v4647_v2, %v1426_v19  ;;  %v1276_v19 = vld [vmem:[%s5723_s4 + $0xb8] sm:$0xff] }
 0x156   : > { %3816 = vmatprep.mubr.f32.mxu1 %v4604_v49  ;;  %3416 = vmatpush3.msra.mxu1 %v1267_v50  ;;  %v1431_v50 = vrot.slane %v4698_v27, 2  ;;  %v1256_v49 = vld [vmem:[%s5723_s4 + $0x18] sm:$0xff] }
 0x157   : > { %1583 = vmatmul.mubr.f32.gmra.mxu0 %v4511_v14  ;;  %3817 = vmatmul.mubr.f32.gmra.mxu1 %v1417_v53  ;;  %v1278_v53 = vld [vmem:[%s5723_s4 + $0xc8] sm:$0xff] }
 0x158   : > { %3417 = vmatprep.subr.mxu1 %v1282_v58  ;;  %3839 = vmatprep.subr.mxu0 %v1299_v59  ;;  %v1262_v58 = vld [vmem:[%s5723_s4 + $0x48] sm:$0xff]  ;;  %v1432_v16 = vsel %vm1196_vm2, %v4732_v26, %v1431_v50  ;;  %v1366_v50 = vsel %vm1139_vm1, %v4672_v11, %v1365_v60  ;;  %v4839_v60 = vrot.slane %v4801_v29, 2 }
 0x159   : > { %3418 = vmatpush3.msra.mxu1 %v1266_v61  ;;  %3840 = vmatpush3.msra.mxu0 %v1299_v59  ;;  %v4750_v59 = vsel %vm1196_vm2, %v4647_v2, %v1220_v46  ;;  %v4755_v61 = vld [vmem:[%s4505_s12 + $0x90] sm:$0xff] }
 0x15a   : > { %3419 = vmatprep.subr.mxu1 %v1281_v62  ;;  %1587 = vmatprep.mubr.f32.mxu0 %v4642_v63  ;;  %5759 = vst [vmem:[#allocation15_spill] sm:$0xff] %v4750_v59  ;;  %v4758_v62 = vld [vmem:[%s4505_s12 + $0x98] sm:$0xff] }
 0x15b   : > { %3819 = vmatprep.mubr.f32.mxu1 %v4654_v4  ;;  %3420 = vmatpush3.msra.mxu1 %v1265_v5  ;;  %v4767_v5 = vsel %vm1139_vm1, %v1362_v8, %v4672_v11  ;;  %v1261_v8 = vld [vmem:[%s5723_s4 + $0x40] sm:$0xff]  ;;  %v4795_v18 = vrot.slane %v4758_v62, 2  ;;  %v4817_v46 = vrot.slane %v4758_v62, 1  ;;  %v1114_v4 = vld [vmem:[%s4505_s12 + $0xb8] sm:$0x3] }
 0x15c   : > { %1588 = vmatmul.mubr.f32.gmra.mxu0 %v4550_v30  ;;  %3820 = vmatmul.mubr.f32.gmra.mxu1 %v1422_v9  ;;  %v1225_v9 = vrot.slane %v1108_v0, 2 }
 0x15d   : > { %3421 = vmatprep.subr.mxu1 %v1280_v6  ;;  %3841 = vmatprep.subr.mxu0 %v1298_v7  ;;  %v4770_v6 = vld [vmem:[%s4505_s12 + $0xa0] sm:$0x3] }
 0x15e   : > { %3422 = vmatpush3.msra.mxu1 %v1264_v10  ;;  %3842 = vmatpush3.msra.mxu0 %v1298_v7  ;;  %v1168_v7 = vrot.slane %v1108_v0, 1  ;;  %v4777_v10 = vsel %vm1196_vm2, %v1428_v34, %v4732_v26  ;;  %v4809_v34 = vsel %vm1196_vm2, %v4732_v26, %v1225_v9  ;;  %v1436_v38 = vrot.slane %v4770_v6, 2 }
 0x15f   : > { %3423 = vmatprep.subr.mxu1 %v1279_v32  ;;  %1592 = vmatprep.mubr.f32.mxu0 %v1361_v24  ;;  %5760 = vst [vmem:[#allocation16_spill] sm:$0xff] %v4777_v10  ;;  %v1433_v24 = vrot.slane %v4755_v61, 2  ;;  %5762 = vst [vmem:[#allocation18_spill] sm:$0xff] %v4809_v34  ;;  %v1367_v9 = vrot.slane %v4620_v56, 1  ;;  %v1370_v34 = vrot.slane %v4650_v3, 1 }
 0x160   : > { %3822 = vmatprep.mubr.f32.mxu1 %v4695_v25  ;;  %3424 = vmatpush3.msra.mxu1 %v1263_v40  ;;  %v4805_v32 = vsel %vm1139_vm1, %v4773_v48, %v1168_v7  ;;  %v4814_v40 = vld [vmem:[%s4505_s12 + $0xb8] sm:$0x3]  ;;  %v1275_v7 = vld [vmem:[%s5723_s4 + $0xb0] sm:$0xff]  ;;  %v1437_v3 = vsel %vm1196_vm2, %v4795_v18, %v1436_v38  ;;  %v1178_v38 = vrot.slane %v1114_v4, 1 }
 0x161   : > { %1593 = vmatmul.mubr.f32.gmra.mxu0 %v4553_v31  ;;  %3823 = vmatmul.mubr.f32.gmra.mxu1 %v1427_v47  ;;  %5761 = vst [vmem:[#allocation17_spill] sm:$0xff] %v4805_v32  ;;  %v1111_v47 = vld [vmem:[%s4505_s12 + $0xa0] sm:$0x3]  ;;  %v1272_v32 = vld [vmem:[%s5723_s4 + $0x98] sm:$0xff] }
 0x162   : > { %3425 = vmatprep.subr.mxu1 %v1278_v53  ;;  %3843 = vmatprep.subr.mxu0 %v1297_v54  ;;  %v4824_v53 = vld [vmem:[%s4505_s12 + $0xc0] sm:$0xff]  ;;  %v1173_v0 = vrot.slane %v1111_v47, 1 }
 0x163   : > { %3426 = vmatpush3.msra.mxu1 %v1262_v58  ;;  %3844 = vmatpush3.msra.mxu0 %v1297_v54  ;;  %v4827_v54 = vld [vmem:[%s4505_s12 + $0xc8] sm:$0xff]  ;;  %v4830_v58 = vld [vmem:[%s4505_s12 + $0xd0] sm:$0x3] }
 0x164   : > { %3427 = vmatprep.subr.mxu1 %v1277_v1  ;;  %1597 = vmatprep.mubr.f32.mxu0 %v4767_v5  ;;  %5763 = vst [vmem:[#allocation19_spill] sm:$0xff] %v4827_v54  ;;  %v1230_v1 = vrot.slane %v1111_v47, 2  ;;  %v4844_v47 = vsel %vm1196_vm2, %v1433_v24, %v4795_v18  ;;  %v4852_v59 = vsel %vm1139_vm1, %v4817_v46, %v1173_v0  ;;  %v4862_v24 = vrot.slane %v4827_v54, 2  ;;  %v1274_v0 = vld [vmem:[%s5723_s4 + $0xa8] sm:$0xff] }
 0x165   : > { %3825 = vmatprep.mubr.f32.mxu1 %v4777_v10  ;;  %3428 = vmatpush3.msra.mxu1 %v1261_v8  ;;  %v1438_v8 = vrot.slane %v4798_v28, 2  ;;  %5764 = vst [vmem:[#allocation20_spill] sm:$0xff] %v4844_v47  ;;  %v1441_v10 = vrot.slane %v4814_v40, 2  ;;  %5765 = vst [vmem:[#allocation21_spill] sm:$0xff] %v4852_v59  ;;  %v1446_v43 = vrot.slane %v4830_v58, 2  ;;  %v4889_v59 = vsel %vm1139_vm1, %v4708_v36, %v1370_v34 }
 0x166   : > { %1598 = vmatmul.mubr.f32.gmra.mxu0 %v4588_v44  ;;  %3826 = vmatmul.mubr.f32.gmra.mxu1 %v1432_v16  ;;  %v1259_v16 = vld [vmem:[%s5723_s4 + $0x30] sm:$0xff]  ;;  %v4856_v25 = vsel %vm1196_vm2, %v4795_v18, %v1230_v1  ;;  %v1235_v1 = vrot.slane %v1114_v4, 2  ;;  %v4902_v34 = vrot.slane %v4827_v54, 1  ;;  %v3170_v54 = vld [vmem:[%s4505_s12 + $0xa0] sm:$0x3] }
 0x167   : > { %3429 = vmatprep.subr.mxu1 %v1276_v19  ;;  %3845 = vmatprep.subr.mxu0 %v1296_v22  ;;  %5766 = vst [vmem:[#allocation22_spill] sm:$0xff] %v4856_v25  ;;  %v1443_v19 = vrot.slane %v4824_v53, 2  ;;  %v4885_v25 = vsel %vm1196_vm2, %v1438_v8, %v4839_v60  ;;  %v1442_v8 = vsel %vm1196_vm2, %v4839_v60, %v1441_v10  ;;  %v1294_v10 = vld [vmem:[%s5723_s4 + $0x148] sm:$0xff] }
 0x168   : > { %3430 = vmatpush3.msra.mxu1 %v1260_v17  ;;  %3846 = vmatpush3.msra.mxu0 %v1296_v22  ;;  %v1295_v22 = vld [vmem:[%s5723_s4 + $0x150] sm:$0xff]  ;;  %v4873_v17 = vrot.slane %v4801_v29, 1 }
 0x169   : > { %3431 = vmatprep.subr.mxu1 %v1275_v7  ;;  %1602 = vmatprep.mubr.f32.mxu0 %v1366_v50  ;;  %v1258_v50 = vld [vmem:[%s5723_s4 + $0x28] sm:$0xff]  ;;  %v4881_v7 = vsel %vm1139_vm1, %v1367_v9, %v4708_v36  ;;  %v1257_v9 = vld [vmem:[%s5723_s4 + $0x20] sm:$0xff] }
 0x16a   : > { %3828 = vmatprep.mubr.f32.mxu1 %v4844_v47  ;;  %3432 = vmatpush3.msra.mxu1 %v1259_v16  ;;  %v1273_v16 = vld [vmem:[%s5723_s4 + $0xa0] sm:$0xff]  ;;  %v4906_v4 = vsel %vm1139_vm1, %v4873_v17, %v1178_v38  ;;  %v4921_v38 = vsel %vm1196_vm2, %v1443_v19, %v4862_v24 }
 0x16b   : > { %1603 = vmatmul.mubr.f32.gmra.mxu0 %v4591_v45  ;;  %3829 = vmatmul.mubr.f32.gmra.mxu1 %v1437_v3  ;;  %5767 = vst [vmem:[#allocation23_spill] sm:$0xff] %v4906_v4  ;;  %v4910_v3 = vsel %vm1196_vm2, %v4839_v60, %v1235_v1  ;;  %v3158_v47 = vld [vmem:[%s4505_s12 + $0x40] sm:$0x3]  ;;  %v4925_v1 = vsel %vm1196_vm2, %v4862_v24, %v1446_v43  ;;  %v3161_v4 = vld [vmem:[%s4505_s12 + $0x58] sm:$0x3] }
 0x16c   : > { %5768 = vst [vmem:[#allocation24_spill] sm:$0xff] %v4910_v3  ;;  %3433 = vmatprep.subr.mxu1 %v1274_v0  ;;  %3847 = vmatprep.subr.mxu0 %v1295_v22  ;;  %v2203_v3 = vrot.slane %v3158_v47, 2  ;;  %v2147_v0 = vrot.slane %v3158_v47, 1  ;;  %v2208_v41 = vrot.slane %v3161_v4, 2  ;;  %v2152_v19 = vrot.slane %v3161_v4, 1  ;;  %v4949_v4 = vld [vmem:[%s4505_s12 + $0x8] sm:$0xff] }
 0x16d   : > { %3434 = vmatpush3.msra.mxu1 %v1258_v50  ;;  %3848 = vmatpush3.msra.mxu0 %v1295_v22  ;;  %v3167_v43 = vld [vmem:[%s4505_s12 + $0x88] sm:$0x3] }
 0x16e   : > { %3435 = vmatprep.subr.mxu1 %v1273_v16  ;;  %1607 = vmatprep.mubr.f32.mxu0 %v4881_v7  ;;  %v4936_v47 = vsel %vm1196_vm2, %v4573_v39, %v2203_v3  ;;  %v4940_v22 = vsel %vm1139_vm1, %v4611_v52, %v2147_v0  ;;  %v2218_v50 = vrot.slane %v3167_v43, 2  ;;  %v2162_v45 = vrot.slane %v3167_v43, 1  ;;  %v3176_v43 = vld [vmem:[%s4505_s12 + $0xd0] sm:$0x3] }
 0x16f   : > { %3831 = vmatprep.mubr.f32.mxu1 %v4885_v25  ;;  %3436 = vmatpush3.msra.mxu1 %v1257_v9  ;;  %v4953_v16 = vsel %vm1196_vm2, %v4617_v55, %v2208_v41  ;;  %v4957_v39 = vsel %vm1139_vm1, %v4672_v11, %v2152_v19  ;;  %v4961_v3 = vsel %vm1196_vm2, %v4647_v2, %v2213_v35  ;;  %v2223_v0 = vrot.slane %v3170_v54, 2  ;;  %v1271_v9 = vld [vmem:[%s5723_s4 + $0x90] sm:$0xff] }
 0x170   : > { %1608 = vmatmul.mubr.f32.gmra.mxu0 %v4620_v56  ;;  %3832 = vmatmul.mubr.f32.gmra.mxu1 %v1442_v8  ;;  %v4970_v55 = vsel %vm1139_vm1, %v4708_v36, %v2157_v51  ;;  %v4974_v11 = vsel %vm1196_vm2, %v4732_v26, %v2218_v50  ;;  %v4978_v35 = vsel %vm1139_vm1, %v4773_v48, %v2162_v45  ;;  %v2167_v2 = vrot.slane %v3170_v54, 1  ;;  %v1255_v41 = vld [vmem:[%s5723_s4 + $0x10] sm:$0xff] }
 0x171   : > { %3437 = vmatprep.subr.mxu1 %v1272_v32  ;;  %3849 = vmatprep.subr.mxu0 %v1294_v10  ;;  %v4985_v8 = vsel %vm1196_vm2, %v4795_v18, %v2223_v0  ;;  %v2228_v36 = vrot.slane %v3173_v37, 2  ;;  %v2172_v51 = vrot.slane %v3173_v37, 1  ;;  %v2233_v19 = vrot.slane %v3176_v43, 2  ;;  %v4990_v32 = vld [vmem:[%s4505_s12 + $0x10] sm:$0x3]  ;;  %v1293_v37 = vld [vmem:[%s5723_s4 + $0x140] sm:$0xff] }
 0x172   : > { %3438 = vmatpush3.msra.mxu1 %v1256_v49  ;;  %3850 = vmatpush3.msra.mxu0 %v1294_v10  ;;  %v1140_v26 = vrot.slane %v4946_v42, 1  ;;  %v1141_v45 = vrot.slane %v4949_v4, 1  ;;  %v4994_v54 = vsel %vm1139_vm1, %v4817_v46, %v2167_v2  ;;  %v2177_v50 = vrot.slane %v3176_v43, 1  ;;  %v1270_v49 = vld [vmem:[%s5723_s4 + $0x88] sm:$0xff]  ;;  %v5028_v2 = vld [vmem:[%s4505_s12 + $0xe0] sm:$0xff] }
 0x173   : > { %5769 = vst [vmem:[#allocation25_spill] sm:$0xff] %v4994_v54  ;;  %3439 = vmatprep.subr.mxu1 %v1271_v9  ;;  %1612 = vmatprep.mubr.f32.mxu0 %v4889_v59  ;;  %v5005_v18 = vsel %vm1196_vm2, %v4839_v60, %v2228_v36  ;;  %v5009_v10 = vsel %vm1139_vm1, %v4873_v17, %v2172_v51  ;;  %v1254_v59 = vld [vmem:[%s5723_s4 + $0x8] sm:$0xff]  ;;  %v1375_v43 = vrot.slane %v4698_v27, 1  ;;  %v5025_v9 = vld [vmem:[%s4505_s12 + $0xd8] sm:$0xff]  ;;  %5773 = vst [vmem:[#allocation29_spill] sm:$0xff] %v5028_v2 }
 0x174   : > { %5770 = vst [vmem:[#allocation26_spill] sm:$0xff] %v5009_v10  ;;  %v5013_v0 = vsel %vm1196_vm2, %v4862_v24, %v2233_v19  ;;  %3834 = vmatprep.mubr.f32.mxu1 %v4921_v38  ;;  %3440 = vmatpush3.msra.mxu1 %v1255_v41  ;;  %v5022_v60 = vsel %vm1139_vm1, %v4902_v34, %v2177_v50  ;;  %5772 = vst [vmem:[#allocation28_spill] sm:$0xff] %v5025_v9  ;;  %v1269_v24 = vld [vmem:[%s5723_s4 + $0x80] sm:$0xff]  ;;  %v5774_v27 = vrot.slane %v4675_v12, 1  ;;  %v3179_v54 = vld [vmem:[%s4505_s12 + $0xe8] sm:$0x3] }
 0x175   : > { %5771 = vst [vmem:[#allocation27_spill] sm:$0xff] %v5022_v60  ;;  %1613 = vmatmul.mubr.f32.gmra.mxu0 %v4623_v57  ;;  %3835 = vmatmul.mubr.f32.gmra.mxu1 %v4925_v1  ;;  %v1143_v36 = vrot.slane %v4990_v32, 1  ;;  %v2179_v51 = vrot.slane %v5025_v9, 1  ;;  %v2180_v19 = vrot.slane %v5028_v2, 1  ;;  %v1253_v1 = vld [vmem:[%s5723_s4] sm:$0xff]  ;;  %v1142_v50 = vsel %vm1139_vm1, %v1140_v26, %v1141_v45 }
 0x176   : > { %v5039_v41 = vsel %vm1139_vm1, %v5774_v27, %v4773_v48  ;;  %3441 = vmatprep.subr.mxu1 %v1270_v49  ;;  %3851 = vmatprep.subr.mxu0 %v1293_v37  ;;  %v2235_v27 = vrot.slane %v5025_v9, 2  ;;  %v2236_v10 = vrot.slane %v5028_v2, 2  ;;  %v1292_v49 = vld [vmem:[%s5723_s4 + $0x138] sm:$0xff]  ;;  %v1376_v26 = vsel %vm1139_vm1, %v4773_v48, %v1375_v43  ;;  %v1291_v9 = vld [vmem:[%s5723_s4 + $0x130] sm:$0xff] }
 0x177   : > { %3442 = vmatpush3.msra.mxu1 %v1254_v59  ;;  %3852 = vmatpush3.msra.mxu0 %v1293_v37  ;;  %v5049_v60 = vsel %vm1139_vm1, %v2179_v51, %v2180_v19  ;;  %v1377_v37 = vrot.slane %v4755_v61, 1  ;;  %v2238_v59 = vrot.slane %v3179_v54, 2  ;;  %v1144_v51 = vsel %vm1139_vm1, %v1141_v45, %v1143_v36  ;;  %v3227_v48 = vld [vmem:[%s5723_s4 + $0x478] sm:$0xff] }
 0x178   : > { %3443 = vmatprep.subr.mxu1 %v1269_v24  ;;  %1617 = vmatprep.mubr.f32.mxu0 %v5039_v41  ;;  %v5063_v2 = vsel %vm1196_vm2, %v2235_v27, %v2236_v10  ;;  %v2182_v24 = vrot.slane %v3179_v54, 1  ;;  %v1380_v36 = vrot.slane %v4770_v6, 1  ;;  %v1288_v27 = vld [vmem:[%s5723_s4 + $0x118] sm:$0xff] }
 0x179   : > { %3444 = vmatpush3.msra.mxu1 %v1253_v1  ;;  %1867 = vmatprep.mubr.f32.mxu1 %v1142_v50  ;;  %v5074_v43 = vsel %vm1196_vm2, %v2236_v10, %v2238_v59  ;;  %v5081_v54 = vsel %vm1139_vm1, %v1377_v37, %v4817_v46  ;;  %v1148_v1 = vrot.slane %v4678_v15, 1  ;;  %v1290_v10 = vld [vmem:[%s5723_s4 + $0x128] sm:$0xff]  ;;  %v1289_v50 = vld [vmem:[%s5723_s4 + $0x120] sm:$0xff]  ;;  %v1197_v59 = vrot.slane %v4946_v42, 2 }
 0x17a   : > { %1618 = vmatmul.mubr.f32.gmra.mxu0 %v4675_v12  ;;  %1868 = vmatmul.mubr.f32.vlgmr.msra.gmra.mxu1 %v4946_v42  ;;  %v5077_v45 = vsel %vm1139_vm1, %v2180_v19, %v2182_v24  ;;  %v1381_v6 = vsel %vm1139_vm1, %v4817_v46, %v1380_v36  ;;  %v1382_v19 = vrot.slane %v4798_v28, 1  ;;  %v1153_v46 = vrot.slane %v4687_v21, 1  ;;  %v1286_v37 = vld [vmem:[%s5723_s4 + $0x108] sm:$0xff]  ;;  %v1285_v24 = vld [vmem:[%s5723_s4 + $0x100] sm:$0xff]  ;;  %v5775_v42 = vld [vmem:[#allocation10_spill] sm:$0xff] }
 0x17b   : > { %3853 = vmatprep.subr.mxu0 %v1292_v49  ;;  %1622 = vmatprep.mubr.f32.mxu0 %v1376_v26  ;;  %v1149_v15 = vsel %vm1139_vm1, %v4528_v23, %v1148_v1  ;;  %v1287_v26 = vld [vmem:[%s5723_s4 + $0x110] sm:$0xff]  ;;  %v3221_v36 = vld [vmem:[%s5723_s4 + $0x448] sm:$0xff]  ;;  %v5776_v1 = vld [vmem:[#allocation19_spill] sm:$0xff] }
 0x17c   : > { %3854 = vmatpush3.msra.mxu0 %v1292_v49  ;;  %1872 = vmatprep.mubr.f32.mxu1 %v1144_v51  ;;  %v5107_v23 = vsel %vm1139_vm1, %v1382_v19, %v4873_v17  ;;  %v1387_v49 = vrot.slane %v4824_v53, 1  ;;  %v1198_v51 = vrot.slane %v4949_v4, 2  ;;  %v3194_v19 = vld [vmem:[%s5723_s4 + $0x370] sm:$0xff] }
 0x17d   : > { %3855 = vmatprep.subr.mxu0 %v1291_v9  ;;  %3893 = vmatprep.subr.mxu1 %v3227_v48 }
 0x17e   : > { %1623 = vmatmul.mubr.f32.gmra.mxu0 %v4684_v20  ;;  %1873 = vmatmul.mubr.f32.gmra.mxu1 %v4949_v4  ;;  %v1199_v4 = vsel %vm1196_vm2, %v1197_v59, %v1198_v51  ;;  %v3205_v59 = vld [vmem:[%s5723_s4 + $0x3c8] sm:$0xff] }
 0x17f   : > { %3856 = vmatpush3.msra.mxu0 %v1291_v9  ;;  %1627 = vmatprep.mubr.f32.mxu0 %v5081_v54  ;;  %v3226_v9 = vld [vmem:[%s5723_s4 + $0x470] sm:$0xff] }
 0x180   : > { %1877 = vmatprep.mubr.f32.mxu1 %v4560_v33  ;;  %3857 = vmatprep.subr.mxu0 %v1290_v10  ;;  %v1385_v33 = vrot.slane %v4814_v40, 1  ;;  %v1154_v40 = vsel %vm1139_vm1, %v4611_v52, %v1153_v46  ;;  %v5136_v52 = vsel %vm1139_vm1, %v1387_v49, %v4902_v34  ;;  %v3209_v46 = vld [vmem:[%s5723_s4 + $0x3e8] sm:$0xff]  ;;  %v5781_v49 = vld [vmem:[#allocation7_spill] sm:$0xff] }
 0x181   : > { %3858 = vmatpush3.msra.mxu0 %v1290_v10  ;;  %3894 = vmatpush3.msra.mxu1 %v3227_v48  ;;  %v3211_v48 = vld [vmem:[%s5723_s4 + $0x3f8] sm:$0xff] }
 0x182   : > { %1628 = vmatmul.mubr.f32.gmra.mxu0 %v4755_v61  ;;  %1878 = vmatmul.mubr.f32.gmra.mxu1 %v4508_v13  ;;  %v3225_v13 = vld [vmem:[%s5723_s4 + $0x468] sm:$0xff]  ;;  %v1386_v21 = vsel %vm1139_vm1, %v4873_v17, %v1385_v33  ;;  %v1390_v17 = vrot.slane %v4830_v58, 1  ;;  %v5779_v33 = vld [vmem:[#allocation5_spill] sm:$0xff] }
 0x183   : > { %1632 = vmatprep.mubr.f32.mxu0 %v1381_v6  ;;  %1882 = vmatprep.mubr.f32.mxu1 %v1149_v15  ;;  %v3195_v6 = vld [vmem:[%s5723_s4 + $0x378] sm:$0xff]  ;;  %v3210_v15 = vld [vmem:[%s5723_s4 + $0x3f0] sm:$0xff] }
 0x184   : > { %3859 = vmatprep.subr.mxu0 %v1289_v50  ;;  %3895 = vmatprep.subr.mxu1 %v3226_v9  ;;  %v1391_v58 = vsel %vm1139_vm1, %v4902_v34, %v1390_v17  ;;  %v1200_v34 = vrot.slane %v4990_v32, 2  ;;  %v5777_v32 = vld [vmem:[#allocation6_spill] sm:$0xff]  ;;  %v3206_v17 = vld [vmem:[%s5723_s4 + $0x3d0] sm:$0xff] }
 0x185   : > { %3860 = vmatpush3.msra.mxu0 %v1289_v50  ;;  %3896 = vmatpush3.msra.mxu1 %v3226_v9  ;;  %v3220_v50 = vld [vmem:[%s5723_s4 + $0x440] sm:$0xff]  ;;  %v5778_v9 = vld [vmem:[#allocation14_spill] sm:$0xff] }
 0x186   : > { %1633 = vmatmul.mubr.f32.gmra.mxu0 %v4758_v62  ;;  %1883 = vmatmul.mubr.f32.gmra.mxu1 %v4511_v14  ;;  %v3224_v14 = vld [vmem:[%s5723_s4 + $0x460] sm:$0xff]  ;;  %v1201_v10 = vsel %vm1196_vm2, %v1198_v51, %v1200_v34  ;;  %v5784_v51 = vld [vmem:[#allocation8_spill] sm:$0xff]  ;;  %v5785_v34 = vld [vmem:[#allocation13_spill] sm:$0xff] }
 0x187   : > { %1637 = vmatprep.mubr.f32.mxu0 %v5107_v23  ;;  %1887 = vmatprep.mubr.f32.mxu1 %v4642_v63 }
 0x188   : > { %3861 = vmatprep.subr.mxu0 %v1288_v27  ;;  %3897 = vmatprep.subr.mxu1 %v3225_v13 }
 0x189   : > { %3862 = vmatpush3.msra.mxu0 %v1288_v27  ;;  %3898 = vmatpush3.msra.mxu1 %v3225_v13  ;;  %v3193_v27 = vld [vmem:[%s5723_s4 + $0x368] sm:$0xff]  ;;  %v5780_v13 = vld [vmem:[#allocation11_spill] sm:$0xff] }
 0x18a   : > { %1638 = vmatmul.mubr.f32.gmra.mxu0 %v4798_v28  ;;  %1888 = vmatmul.mubr.f32.gmra.mxu1 %v4550_v30  ;;  %v3223_v30 = vld [vmem:[%s5723_s4 + $0x458] sm:$0xff] }
 0x18b   : > { %1642 = vmatprep.mubr.f32.mxu0 %v1386_v21  ;;  %1892 = vmatprep.mubr.f32.mxu1 %v1154_v40  ;;  %v3208_v21 = vld [vmem:[%s5723_s4 + $0x3e0] sm:$0xff] }
 0x18c   : > { %3863 = vmatprep.subr.mxu0 %v1287_v26  ;;  %3899 = vmatprep.subr.mxu1 %v3224_v14  ;;  %v3192_v40 = vld [vmem:[%s5723_s4 + $0x360] sm:$0xff] }
 0x18d   : > { %3864 = vmatpush3.msra.mxu0 %v1287_v26  ;;  %3900 = vmatpush3.msra.mxu1 %v3224_v14  ;;  %v3207_v26 = vld [vmem:[%s5723_s4 + $0x3d8] sm:$0xff] }
 0x18e   : > { %1643 = vmatmul.mubr.f32.gmra.mxu0 %v4801_v29  ;;  %1893 = vmatmul.mubr.f32.gmra.mxu1 %v4553_v31  ;;  %v3222_v31 = vld [vmem:[%s5723_s4 + $0x450] sm:$0xff]  ;;  %v3191_v14 = vld [vmem:[%s5723_s4 + $0x358] sm:$0xff] }
 0x18f   : > { %1647 = vmatprep.mubr.f32.mxu0 %v5136_v52  ;;  %1897 = vmatprep.mubr.f32.mxu1 %v4767_v5 }
 0x190   : > { %3865 = vmatprep.subr.mxu0 %v1286_v37  ;;  %3901 = vmatprep.subr.mxu1 %v3223_v30 }
 0x191   : > { %3866 = vmatpush3.msra.mxu0 %v1286_v37  ;;  %3902 = vmatpush3.msra.mxu1 %v3223_v30  ;;  %v5782_v37 = vld [vmem:[#allocation12_spill] sm:$0xff]  ;;  %v3190_v30 = vld [vmem:[%s5723_s4 + $0x350] sm:$0xff] }
 0x192   : > { %1648 = vmatmul.mubr.f32.gmra.mxu0 %v4824_v53  ;;  %1898 = vmatmul.mubr.f32.gmra.mxu1 %v4588_v44 }
 0x193   : > { %1652 = vmatprep.mubr.f32.mxu0 %v1391_v58  ;;  %1902 = vmatprep.mubr.f32.mxu1 %v5775_v42  ;;  %v5783_v58 = vld [vmem:[#allocation17_spill] sm:$0xff]  ;;  %v3188_v42 = vld [vmem:[%s5723_s4 + $0x340] sm:$0xff] }
 0x194   : > { %3867 = vmatprep.subr.mxu0 %v1285_v24  ;;  %3903 = vmatprep.subr.mxu1 %v3222_v31 }
 0x195   : > { %3868 = vmatpush3.msra.mxu0 %v1285_v24  ;;  %3904 = vmatpush3.msra.mxu1 %v3222_v31  ;;  %v3189_v24 = vld [vmem:[%s5723_s4 + $0x348] sm:$0xff]  ;;  %v3204_v31 = vld [vmem:[%s5723_s4 + $0x3c0] sm:$0xff] }
 0x196   : > { %1653 = vmatmul.mubr.f32.gmra.mxu0 %v5776_v1  ;;  %1903 = vmatmul.mubr.f32.gmra.mxu1 %v5777_v32 }
 0x197   : > { %1907 = vmatprep.mubr.f32.mxu1 %v4881_v7  ;;  %3869 = vmatprep.mubr.f32.mxu0 %v1199_v4  ;;  %v3203_v4 = vld [vmem:[%s5723_s4 + $0x3b8] sm:$0xff] }
 0x198   : > { %3525 = vmatprep.subr.mxu0 %v3211_v48  ;;  %3905 = vmatprep.subr.mxu1 %v3221_v36  ;;  %v5786_v48 = vld [vmem:[#allocation9_spill] sm:$0xff] }
 0x199   : > { %3906 = vmatpush3.msra.mxu1 %v3221_v36  ;;  %v3187_v36 = vld [vmem:[%s5723_s4 + $0x338] sm:$0xff] }
 0x19a   : > { %1908 = vmatmul.mubr.f32.gmra.mxu1 %v4620_v56  ;;  %3870 = vmatmul.mubr.f32.vlgmr.msra.gmra.mxu0 %v1201_v10  ;;  %v3219_v10 = vld [vmem:[%s5723_s4 + $0x438] sm:$0xff] }
 0x19b   : > { %3526 = vmatpush3.msra.mxu0 %v3195_v6  ;;  %1912 = vmatprep.mubr.f32.mxu1 %v5778_v9  ;;  %v3202_v6 = vld [vmem:[%s5723_s4 + $0x3b0] sm:$0xff]  ;;  %v3201_v9 = vld [vmem:[%s5723_s4 + $0x3a8] sm:$0xff] }
 0x19c   : > { %3527 = vmatprep.subr.mxu0 %v3210_v15  ;;  %3872 = vmatprep.mubr.f32.mxu0 %v5779_v33  ;;  %v5787_v15 = vld [vmem:[#allocation15_spill] sm:$0xff]  ;;  %v5789_v33 = vld [vmem:[#allocation16_spill] sm:$0xff] }
 0x19d   : > { %3528 = vmatpush3.msra.mxu0 %v3194_v19  ;;  %3907 = vmatprep.subr.mxu1 %v3220_v50  ;;  %v3186_v19 = vld [vmem:[%s5723_s4 + $0x330] sm:$0xff] }
 0x19e   : > { %1913 = vmatmul.mubr.f32.gmra.mxu1 %v4623_v57  ;;  %3873 = vmatmul.mubr.f32.gmra.mxu0 %v5780_v13  ;;  %v5790_v13 = vld [vmem:[#allocation18_spill] sm:$0xff] }
 0x19f   : > { %3529 = vmatprep.subr.mxu0 %v3209_v46  ;;  %1917 = vmatprep.mubr.f32.mxu1 %v5039_v41  ;;  %v3218_v46 = vld [vmem:[%s5723_s4 + $0x430] sm:$0xff] }
 0x1a0   : > { %3530 = vmatpush3.msra.mxu0 %v3193_v27  ;;  %3875 = vmatprep.mubr.f32.mxu0 %v5781_v49  ;;  %v3185_v27 = vld [vmem:[%s5723_s4 + $0x328] sm:$0xff] }
 0x1a1   : > { %3531 = vmatprep.subr.mxu0 %v3208_v21  ;;  %3908 = vmatpush3.msra.mxu1 %v3220_v50  ;;  %v5788_v50 = vld [vmem:[#allocation21_spill] sm:$0xff]  ;;  %v3200_v21 = vld [vmem:[%s5723_s4 + $0x3a0] sm:$0xff] }
 0x1a2   : > { %3532 = vmatpush3.msra.mxu0 %v3192_v40  ;;  %1918 = vmatmul.mubr.f32.gmra.mxu1 %v4675_v12  ;;  %v3217_v40 = vld [vmem:[%s5723_s4 + $0x428] sm:$0xff] }
 0x1a3   : > { %3876 = vmatmul.mubr.f32.gmra.mxu0 %v5782_v37  ;;  %3533 = vmatprep.subr.mxu0 %v3207_v26  ;;  %v3184_v26 = vld [vmem:[%s5723_s4 + $0x320] sm:$0xff] }
 0x1a4   : > { %3534 = vmatpush3.msra.mxu0 %v3191_v14  ;;  %1922 = vmatprep.mubr.f32.mxu1 %v5783_v58  ;;  %v3199_v14 = vld [vmem:[%s5723_s4 + $0x398] sm:$0xff]  ;;  %v3216_v37 = vld [vmem:[%s5723_s4 + $0x420] sm:$0xff] }
 0x1a5   : > { %3535 = vmatprep.subr.mxu0 %v3206_v17  ;;  %3878 = vmatprep.mubr.f32.mxu0 %v5784_v51  ;;  %v5791_v17 = vld [vmem:[#allocation20_spill] sm:$0xff]  ;;  %v5792_v58 = vld [vmem:[#allocation22_spill] sm:$0xff] }
 0x1a6   : > { %3536 = vmatpush3.msra.mxu0 %v3190_v30  ;;  %1923 = vmatmul.mubr.f32.gmra.mxu1 %v4684_v20  ;;  %v3183_v30 = vld [vmem:[%s5723_s4 + $0x318] sm:$0xff] }
 0x1a7   : > { %3879 = vmatmul.mubr.f32.gmra.mxu0 %v5785_v34  ;;  %3537 = vmatprep.subr.mxu0 %v3205_v59  ;;  %v3198_v59 = vld [vmem:[%s5723_s4 + $0x390] sm:$0xff]  ;;  %v5793_v34 = vld [vmem:[#allocation23_spill] sm:$0xff] }
 0x1a8   : > { %3538 = vmatpush3.msra.mxu0 %v3189_v24  ;;  %1927 = vmatprep.mubr.f32.mxu1 %v5081_v54  ;;  %v3215_v24 = vld [vmem:[%s5723_s4 + $0x418] sm:$0xff] }
 0x1a9   : > { %3539 = vmatprep.subr.mxu0 %v3204_v31  ;;  %3881 = vmatprep.mubr.f32.mxu0 %v5786_v48  ;;  %v3182_v31 = vld [vmem:[%s5723_s4 + $0x310] sm:$0xff] }
 0x1aa   : > { %3540 = vmatpush3.msra.mxu0 %v3188_v42  ;;  %1928 = vmatmul.mubr.f32.gmra.mxu1 %v4755_v61  ;;  %v3197_v42 = vld [vmem:[%s5723_s4 + $0x388] sm:$0xff] }
 0x1ab   : > { %3882 = vmatmul.mubr.f32.gmra.mxu0 %v5787_v15  ;;  %3541 = vmatprep.subr.mxu0 %v3203_v4  ;;  %v3214_v4 = vld [vmem:[%s5723_s4 + $0x410] sm:$0xff]  ;;  %v3213_v15 = vld [vmem:[%s5723_s4 + $0x408] sm:$0xff] }
 0x1ac   : > { %3542 = vmatpush3.msra.mxu0 %v3187_v36  ;;  %3909 = vmatprep.subr.mxu1 %v3219_v10  ;;  %v3181_v36 = vld [vmem:[%s5723_s4 + $0x308] sm:$0xff] }
 0x1ad   : > { %3543 = vmatprep.subr.mxu0 %v3202_v6  ;;  %1932 = vmatprep.mubr.f32.mxu1 %v5788_v50  ;;  %v3196_v6 = vld [vmem:[%s5723_s4 + $0x380] sm:$0xff] }
 0x1ae   : > { %3884 = vmatprep.mubr.f32.mxu0 %v5789_v33  ;;  %3544 = vmatpush3.msra.mxu0 %v3186_v19  ;;  %v3180_v19 = vld [vmem:[%s5723_s4 + $0x300] sm:$0xff] }
 0x1af   : > { %3910 = vmatpush3.msra.mxu1 %v3219_v10  ;;  %3885 = vmatmul.mubr.f32.gmra.mxu0 %v5790_v13  ;;  %v5794_v10 = vld [vmem:[#allocation24_spill] sm:$0xff]  ;;  %v3212_v50 = vld [vmem:[%s5723_s4 + $0x400] sm:$0xff] }
 0x1b0   : > { %1933 = vmatmul.mubr.f32.gmra.mxu1 %v4758_v62  ;;  %3545 = vmatprep.subr.mxu0 %v3201_v9  ;;  %v4046_v9 = vld [vmem:[%s4505_s12 + $0x30] sm:$0xff] }
 0x1b1   : > { %3911 = vmatprep.subr.mxu1 %v3218_v46  ;;  %3546 = vmatpush3.msra.mxu0 %v3185_v27 }
 0x1b2   : > { %3912 = vmatpush3.msra.mxu1 %v3218_v46  ;;  %3547 = vmatprep.subr.mxu0 %v3200_v21  ;;  %v4047_v46 = vld [vmem:[%s4505_s12 + $0x38] sm:$0xff] }
 0x1b3   : > { %3913 = vmatprep.subr.mxu1 %v3217_v40  ;;  %1937 = vmatprep.mubr.f32.mxu1 %v5107_v23 }
 0x1b4   : > { %3887 = vmatprep.mubr.f32.mxu0 %v5791_v17  ;;  %3548 = vmatpush3.msra.mxu0 %v3184_v26 }
 0x1b5   : > { %3914 = vmatpush3.msra.mxu1 %v3217_v40  ;;  %3888 = vmatmul.mubr.f32.gmra.mxu0 %v5792_v58 }
 0x1b6   : > { %1938 = vmatmul.mubr.f32.gmra.mxu1 %v4798_v28  ;;  %3549 = vmatprep.subr.mxu0 %v3199_v14 }
 0x1b7   : > { %3915 = vmatprep.subr.mxu1 %v3216_v37  ;;  %3550 = vmatpush3.msra.mxu0 %v3183_v30 }
 0x1b8   : > { %3916 = vmatpush3.msra.mxu1 %v3216_v37  ;;  %3551 = vmatprep.subr.mxu0 %v3198_v59 }
 0x1b9   : > { %3917 = vmatprep.subr.mxu1 %v3215_v24  ;;  %1942 = vmatprep.mubr.f32.mxu1 %v5793_v34 }
 0x1ba   : > { %3890 = vmatprep.mubr.f32.mxu0 %v4885_v25  ;;  %3552 = vmatpush3.msra.mxu0 %v3182_v31 }
 0x1bb   : > { %3918 = vmatpush3.msra.mxu1 %v3215_v24  ;;  %3891 = vmatmul.mubr.f32.gmra.mxu0 %v5794_v10 }
 0x1bc   : > { %1943 = vmatmul.mubr.f32.gmra.mxu1 %v4801_v29  ;;  %3553 = vmatprep.subr.mxu0 %v3197_v42 }
 0x1bd   : > { %3919 = vmatprep.subr.mxu1 %v3214_v4  ;;  %3554 = vmatpush3.msra.mxu0 %v3181_v36 }
 0x1be   : > { %3920 = vmatpush3.msra.mxu1 %v3214_v4  ;;  %3555 = vmatprep.subr.mxu0 %v3196_v6 }
 0x1bf   : > { %3921 = vmatprep.subr.mxu1 %v3213_v15  ;;  %3556 = vmatpush3.msra.mxu0 %v3180_v19 }
 0x1c0   : > { %2369 = vmatprep.mubr.f32.mxu0 %v4642_v63  ;;  %3922 = vmatpush3.msra.mxu1 %v3213_v15  ;;  %v2687_v63 = vld [vmem:[%s5726_s7 + $0x70] sm:$0xff] }
 0x1c1   : > { %2370 = vmatmul.mubr.f32.vlgmr.msra.gmra.mxu0 %v4046_v9  ;;  %3923 = vmatprep.subr.mxu1 %v3212_v50 }
 0x1c2   : > { %3924 = vmatpush3.msra.mxu1 %v3212_v50  ;;  %3925 = vmatprep.mubr.f32.mxu1 %v5781_v49 }
 0x1c3   : > { %3926 = vmatmul.mubr.f32.vlgmr.msra.gmra.mxu1 %v4936_v47  ;;  %2374 = vmatprep.mubr.f32.mxu0 %v4940_v22  ;;  %v2678_v47 = vld [vmem:[%s5726_s7 + $0x28] sm:$0xff]  ;;  %v2677_v22 = vld [vmem:[%s5726_s7 + $0x20] sm:$0xff] }
 0x1c4   : > { %3928 = vmatprep.mubr.f32.mxu1 %v5784_v51 }
 0x1c5   : > { %2375 = vmatmul.mubr.f32.gmra.mxu0 %v4047_v46 }
 0x1c6   : > { %2379 = vmatprep.mubr.f32.mxu0 %v4767_v5  ;;  %v2683_v5 = vld [vmem:[%s5726_s7 + $0x50] sm:$0xff] }
 0x1c7   : > { %3929 = vmatmul.mubr.f32.gmra.mxu1 %v4953_v16  ;;  %v2676_v16 = vld [vmem:[%s5726_s7 + $0x18] sm:$0xff] }
 0x1c8   : > { %3931 = vmatprep.mubr.f32.mxu1 %v5786_v48 }
 0x1c9   : > { %2380 = vmatmul.mubr.f32.gmra.mxu0 %v4588_v44  ;;  %v5795_v44 = vld [vmem:[#allocation25_spill] sm:$0xff] }
 0x1ca   : > { %2384 = vmatprep.mubr.f32.mxu0 %v4957_v39  ;;  %v2675_v39 = vld [vmem:[%s5726_s7 + $0x10] sm:$0xff] }
 0x1cb   : > { %3932 = vmatmul.mubr.f32.gmra.mxu1 %v4961_v3  ;;  %v2674_v3 = vld [vmem:[%s5726_s7 + $0x8] sm:$0xff] }
 0x1cc   : > { %3934 = vmatprep.mubr.f32.mxu1 %v5789_v33 }
 0x1cd   : > { %2385 = vmatmul.mubr.f32.gmra.mxu0 %v5777_v32 }
 0x1ce   : > { %2389 = vmatprep.mubr.f32.mxu0 %v4881_v7  ;;  %v2680_v7 = vld [vmem:[%s5726_s7 + $0x38] sm:$0xff] }
 0x1cf   : > { %3935 = vmatmul.mubr.f32.gmra.mxu1 %v4974_v11 }
 0x1d0   : > { %3937 = vmatprep.mubr.f32.mxu1 %v5791_v17 }
 0x1d1   : > { %2390 = vmatmul.mubr.f32.gmra.mxu0 %v4620_v56  ;;  %v5796_v56 = vld [vmem:[#allocation26_spill] sm:$0xff] }
 0x1d2   : > { %2394 = vmatprep.mubr.f32.mxu0 %v4970_v55  ;;  %v2673_v55 = vld [vmem:[%s5726_s7] sm:$0xff] }
 0x1d3   : > { %3938 = vmatmul.mubr.f32.gmra.mxu1 %v4985_v8 }
 0x1d4   : > { %3940 = vmatprep.mubr.f32.mxu1 %v4885_v25  ;;  %v2685_v25 = vld [vmem:[%s5726_s7 + $0x60] sm:$0xff] }
 0x1d5   : > { %2395 = vmatmul.mubr.f32.gmra.mxu0 %v4623_v57  ;;  %v2688_v57 = vld [vmem:[%s5726_s7 + $0x78] sm:$0xff] }
 0x1d6   : > { %2399 = vmatprep.mubr.f32.mxu0 %v5039_v41  ;;  %3949 = vmatprep.subr.mxu1 %v2688_v57 }
 0x1d7   : > { %3941 = vmatmul.mubr.f32.gmra.mxu1 %v5005_v18 }
 0x1d8   : > { %3943 = vmatprep.mubr.f32.mxu1 %v4921_v38  ;;  %3950 = vmatpush3.msra.mxu1 %v2688_v57  ;;  %v2679_v38 = vld [vmem:[%s5726_s7 + $0x30] sm:$0xff] }
 0x1d9   : > { %2400 = vmatmul.mubr.f32.gmra.mxu0 %v4675_v12  ;;  %3951 = vmatprep.subr.mxu1 %v2687_v63  ;;  %v5797_v12 = vld [vmem:[#allocation27_spill] sm:$0xff] }
 0x1da   : > { %2404 = vmatprep.mubr.f32.mxu0 %v4978_v35  ;;  %3952 = vmatpush3.msra.mxu1 %v2687_v63 }
 0x1db   : > { %3944 = vmatmul.mubr.f32.gmra.mxu1 %v5013_v0 }
 0x1dc   : > { %3946 = vmatprep.mubr.f32.mxu1 %v5063_v2 }
 0x1dd   : > { %2405 = vmatmul.mubr.f32.gmra.mxu0 %v4684_v20  ;;  %v2686_v20 = vld [vmem:[%s5726_s7 + $0x68] sm:$0xff] }
 0x1de   : > { %2409 = vmatprep.mubr.f32.mxu0 %v5081_v54  ;;  %3953 = vmatprep.subr.mxu1 %v2686_v20 }
 0x1df   : > { %3947 = vmatmul.mubr.f32.gmra.mxu1 %v5074_v43 }
 0x1e0   : > { %3954 = vmatpush3.msra.mxu1 %v2686_v20 }
 0x1e1   : > { %2410 = vmatmul.mubr.f32.gmra.mxu0 %v4755_v61  ;;  %3955 = vmatprep.subr.mxu1 %v2685_v25  ;;  %v5798_v61 = vld [vmem:[#allocation28_spill] sm:$0xff] }
 0x1e2   : > { %2414 = vmatprep.mubr.f32.mxu0 %v5795_v44  ;;  %3956 = vmatpush3.msra.mxu1 %v2685_v25 }
 0x1e5   : > { %2415 = vmatmul.mubr.f32.gmra.mxu0 %v4758_v62  ;;  %v2684_v62 = vld [vmem:[%s5726_s7 + $0x58] sm:$0xff] }
 0x1e6   : > { %2419 = vmatprep.mubr.f32.mxu0 %v5107_v23  ;;  %3957 = vmatprep.subr.mxu1 %v2684_v62 }
 0x1e7   : > { %3958 = vmatpush3.msra.mxu1 %v2684_v62 }
 0x1e8   : > { %3959 = vmatprep.subr.mxu1 %v2683_v5 }
 0x1e9   : > { %2420 = vmatmul.mubr.f32.gmra.mxu0 %v4798_v28  ;;  %v5799_v28 = vld [vmem:[#allocation29_spill] sm:$0xff]  ;;  %3960 = vmatpush3.msra.mxu1 %v2683_v5 }
 0x1ea   : > { %2424 = vmatprep.mubr.f32.mxu0 %v5796_v56 }
 0x1ed   : > { %2425 = vmatmul.mubr.f32.gmra.mxu0 %v4801_v29  ;;  %v2682_v29 = vld [vmem:[%s5726_s7 + $0x48] sm:$0xff] }
 0x1ee   : > { %2429 = vmatprep.mubr.f32.mxu0 %v5136_v52  ;;  %3961 = vmatprep.subr.mxu1 %v2682_v29 }
 0x1ef   : > { %3962 = vmatpush3.msra.mxu1 %v2682_v29 }
 0x1f1   : > { %2430 = vmatmul.mubr.f32.gmra.mxu0 %v4824_v53  ;;  %v2681_v53 = vld [vmem:[%s5726_s7 + $0x40] sm:$0xff] }
 0x1f2   : > { %2434 = vmatprep.mubr.f32.mxu0 %v5797_v12  ;;  %3963 = vmatprep.subr.mxu1 %v2681_v53 }
 0x1f3   : > { %3964 = vmatpush3.msra.mxu1 %v2681_v53 }
 0x1f4   : > { %3965 = vmatprep.subr.mxu1 %v2680_v7 }
 0x1f5   : > { %2435 = vmatmul.mubr.f32.gmra.mxu0 %v5776_v1  ;;  %3966 = vmatpush3.msra.mxu1 %v2680_v7 }
 0x1f6   : > { %2439 = vmatprep.mubr.f32.mxu0 %v5049_v60  ;;  %3967 = vmatprep.subr.mxu1 %v2679_v38 }
 0x1f7   : > { %3968 = vmatpush3.msra.mxu1 %v2679_v38 }
 0x1f8   : > { %3969 = vmatprep.subr.mxu1 %v2678_v47 }
 0x1f9   : > { %2440 = vmatmul.mubr.f32.gmra.mxu0 %v5798_v61  ;;  %3970 = vmatpush3.msra.mxu1 %v2678_v47 }
 0x1fa   : > { %2444 = vmatprep.mubr.f32.mxu0 %v5077_v45  ;;  %3971 = vmatprep.subr.mxu1 %v2677_v22 }
 0x1fb   : > { %3972 = vmatpush3.msra.mxu1 %v2677_v22 }
 0x1fc   : > { %3973 = vmatprep.subr.mxu1 %v2676_v16 }
 0x1fd   : > { %2445 = vmatmul.mubr.f32.gmra.mxu0 %v5799_v28  ;;  %3974 = vmatpush3.msra.mxu1 %v2676_v16 }
 0x1fe   : > { %3975 = vmatprep.subr.mxu1 %v2675_v39 }
 0x1ff   : > { %3976 = vmatpush3.msra.mxu1 %v2675_v39 }
 0x200   : > { %3977 = vmatprep.subr.mxu1 %v2674_v3 }
 0x201   : > { %3978 = vmatpush3.msra.mxu1 %v2674_v3 }
 0x202   : > { %3979 = vmatprep.subr.mxu1 %v2673_v55 }
 0x203   : > { %3980 = vmatpush3.msra.mxu1 %v2673_v55 }
 0x212   : > { %v3333_v11 = vpop.f32.mrf.mxu0  ;;  %v3815_v35 = vpop.f32.mrf.mxu1 }
 0x214   : > { %v3334_v8 = vpop.f32.mrf.mxu0  ;;  %v1724_v18 = vpop.f32.mrf.mxu1 }
 0x215   : > { %v3335_v0 = vadd.f32 %v3334_v8, %v3333_v11 }
 0x217   : > { %v5419_v60 = vadd.f32 %v3335_v0, %v1724_v18  ;;  %v3336_v2 = vpop.f32.mrf.mxu0  ;;  %v3818_v41 = vpop.f32.mrf.mxu1 }
 0x219   : > { %v3337_v43 = vpop.f32.mrf.mxu0  ;;  %v1734_v45 = vpop.f32.mrf.mxu1 }
 0x21a   : > { %v3338_v54 = vadd.f32 %v3337_v43, %v3336_v2 }
 0x21c   : > { %v5421_v23 = vadd.f32 %v3815_v35, %v3338_v54  ;;  %v3339_v52 = vpop.f32.mrf.mxu0  ;;  %v3821_v1 = vpop.f32.mrf.mxu1 }
 0x21e   : > { %v3340_v32 = vpop.f32.mrf.mxu0  ;;  %v1744_v49 = vpop.f32.mrf.mxu1 }
 0x21f   : > { %v3341_v51 = vadd.f32 %v3340_v32, %v3339_v52 }
 0x221   : > { %v5423_v48 = vadd.f32 %v3341_v51, %v1734_v45  ;;  %v3342_v33 = vpop.f32.mrf.mxu0  ;;  %v3824_v27 = vpop.f32.mrf.mxu1 }
 0x223   : > { %v3343_v13 = vpop.f32.mrf.mxu0  ;;  %v1754_v21 = vpop.f32.mrf.mxu1 }
 0x224   : > { %v3344_v40 = vadd.f32 %v3343_v13, %v3342_v33 }
 0x226   : > { %v5425_v26 = vadd.f32 %v3818_v41, %v3344_v40  ;;  %v3345_v14 = vpop.f32.mrf.mxu0  ;;  %v3827_v17 = vpop.f32.mrf.mxu1 }
 0x228   : > { %v3346_v37 = vpop.f32.mrf.mxu0  ;;  %v1764_v30 = vpop.f32.mrf.mxu1 }
 0x229   : > { %v3347_v58 = vadd.f32 %v3346_v37, %v3345_v14 }
 0x22b   : > { %v5427_v59 = vadd.f32 %v3347_v58, %v1744_v49  ;;  %v3348_v24 = vpop.f32.mrf.mxu0  ;;  %v3830_v31 = vpop.f32.mrf.mxu1 }
 0x22d   : > { %v3349_v34 = vpop.f32.mrf.mxu0  ;;  %v1774_v42 = vpop.f32.mrf.mxu1 }
 0x22e   : > { %v3350_v4 = vadd.f32 %v3349_v34, %v3348_v24 }
 0x230   : > { %v5429_v36 = vadd.f32 %v3821_v1, %v3350_v4  ;;  %v3351_v10 = vpop.f32.mrf.mxu0  ;;  %v3833_v6 = vpop.f32.mrf.mxu1 }
 0x232   : > { %v3352_v15 = vpop.f32.mrf.mxu0  ;;  %v1784_v19 = vpop.f32.mrf.mxu1 }
 0x233   : > { %v3353_v50 = vadd.f32 %v3352_v15, %v3351_v10 }
 0x235   : > { %v5431_v9 = vadd.f32 %v3353_v50, %v1754_v21  ;;  %v3354_v46 = vpop.f32.mrf.mxu0  ;;  %v3836_v44 = vpop.f32.mrf.mxu1 }
 0x237   : > { %v3355_v56 = vpop.f32.mrf.mxu0  ;;  %v1794_v57 = vpop.f32.mrf.mxu1 }
 0x238   : > { %v3356_v63 = vadd.f32 %v3355_v56, %v3354_v46 }
 0x23a   : > { %v5433_v12 = vadd.f32 %v3824_v27, %v3356_v63  ;;  %v3357_v20 = vpop.f32.mrf.mxu0  ;;  %v5435_v25 = vpop.f32.mrf.mxu1 }
 0x23c   : > { %v3358_v61 = vpop.f32.mrf.mxu0  ;;  %v5437_v62 = vpop.f32.mrf.mxu1 }
 0x23d   : > { %v3359_v5 = vadd.f32 %v3358_v61, %v3357_v20 }
 0x23e   : > { %v3360_v28 = vpop.f32.mrf.mxu0  ;;  %v5439_v29 = vpop.f32.mrf.mxu1 }
 0x23f   : > { %v5441_v53 = vadd.f32 %v3359_v5, %v1764_v30 }
 0x240   : > { %v3361_v7 = vpop.f32.mrf.mxu0  ;;  %v5443_v38 = vpop.f32.mrf.mxu1 }
 0x241   : > { %v3362_v47 = vadd.f32 %v3361_v7, %v3360_v28 }
 0x242   : > { %v3363_v22 = vpop.f32.mrf.mxu0  ;;  %v5445_v16 = vpop.f32.mrf.mxu1 }
 0x243   : > { %v5447_v39 = vadd.f32 %v3827_v17, %v3362_v47 }
 0x244   : > { %v3364_v3 = vpop.f32.mrf.mxu0  ;;  %v5449_v55 = vpop.f32.mrf.mxu1 }
 0x245   : > { %v3365_v11 = vadd.f32 %v3364_v3, %v3363_v22 }
 0x246   : > { %v3366_v35 = vpop.f32.mrf.mxu0  ;;  %v5451_v8 = vpop.f32.mrf.mxu1 }
 0x247   : > { %v5453_v18 = vadd.f32 %v3365_v11, %v1774_v42 }
 0x248   : > { %v3367_v0 = vpop.f32.mrf.mxu0  ;;  %v5455_v2 = vpop.f32.mrf.mxu1 }
 0x249   : > { %v3368_v41 = vadd.f32 %v3367_v0, %v3366_v35 }
 0x24a   : > { %v3369_v43 = vpop.f32.mrf.mxu0  ;;  %v5457_v45 = vpop.f32.mrf.mxu1 }
 0x24b   : > { %v5459_v54 = vadd.f32 %v3830_v31, %v3368_v41 }
 0x24c   : > { %v3370_v52 = vpop.f32.mrf.mxu0  ;;  %v5461_v1 = vpop.f32.mrf.mxu1 }
 0x24d   : > { %5800 = vst [vmem:[#allocation10_spill] sm:$0xff] %v5459_v54  ;;  %v3371_v32 = vadd.f32 %v3370_v52, %v3369_v43 }
 0x24e   : > { %v3372_v49 = vpop.f32.mrf.mxu0  ;;  %v5463_v51 = vpop.f32.mrf.mxu1 }
 0x24f   : > { %v5465_v33 = vadd.f32 %v3371_v32, %v1784_v19 }
 0x250   : > { %v3373_v27 = vpop.f32.mrf.mxu0  ;;  %v5467_v13 = vpop.f32.mrf.mxu1 }
 0x251   : > { %5801 = vst [vmem:[#allocation19_spill] sm:$0xff] %v5465_v33  ;;  %v3374_v21 = vadd.f32 %v3373_v27, %v3372_v49 }
 0x252   : > { %v3375_v40 = vpop.f32.mrf.mxu0  ;;  %v5469_v14 = vpop.f32.mrf.mxu1 }
 0x253   : > { %v1790_v17 = vadd.f32 %v3833_v6, %v3374_v21 }
 0x254   : > { %v3376_v37 = vpop.f32.mrf.mxu0  ;;  %v5471_v30 = vpop.f32.mrf.mxu1 }
 0x255   : > { %v3377_v58 = vadd.f32 %v3376_v37, %v3375_v40 }
 0x256   : > { %v3378_v24 = vpop.f32.mrf.mxu0  ;;  %v5473_v31 = vpop.f32.mrf.mxu1 }
 0x257   : > { %v5475_v34 = vadd.f32 %v3377_v58, %v1794_v57 }
 0x258   : > { %v3379_v42 = vpop.f32.mrf.mxu0  ;;  %v5477_v4 = vpop.f32.mrf.mxu1 }
 0x259   : > { %5802 = vst [vmem:[#allocation6_spill] sm:$0xff] %v5475_v34  ;;  %v3380_v10 = vadd.f32 %v3379_v42, %v3378_v24 }
 0x25a   : > { %v5479_v15 = vpop.f32.mrf.mxu1  ;;  %v3871_v19 = vpop.f32.mrf.mxu0 }
 0x25b   : > { %v1800_v50 = vadd.f32 %v3836_v44, %v3380_v10 }
 0x25c   : > { %v5481_v46 = vpop.f32.mrf.mxu1  ;;  %v2014_v6 = vpop.f32.mrf.mxu0 }
 0x25e   : > { %v5483_v56 = vpop.f32.mrf.mxu1  ;;  %v5485_v63 = vpop.f32.mrf.mxu0 }
 0x260   : > { %v5487_v20 = vpop.f32.mrf.mxu1  ;;  %v2024_v61 = vpop.f32.mrf.mxu0 }
 0x262   : > { %v5489_v57 = vpop.f32.mrf.mxu1 }
 0x263   : > { %v5491_v5 = vpop.f32.mrf.mxu0 }
 0x264   : > { %v5493_v28 = vpop.f32.mrf.mxu1 }
 0x265   : > { %v5495_v7 = vpop.f32.mrf.mxu0 }
 0x266   : > { %v5497_v47 = vpop.f32.mrf.mxu1 }
 0x267   : > { %v5499_v44 = vpop.f32.mrf.mxu0 }
 0x268   : > { %v5501_v22 = vpop.f32.mrf.mxu1 }
 0x269   : > { %v5503_v3 = vpop.f32.mrf.mxu0 }
 0x26a   : > { %v5505_v11 = vpop.f32.mrf.mxu1 }
 0x26b   : > { %5803 = vst [vmem:[#allocation14_spill] sm:$0xff] %v5505_v11  ;;  %v5507_v35 = vpop.f32.mrf.mxu0 }
 0x26c   : > { %v5509_v0 = vpop.f32.mrf.mxu1 }
 0x26d   : > { %5804 = vst [vmem:[#allocation5_spill] sm:$0xff] %v5509_v0  ;;  %v5511_v41 = vpop.f32.mrf.mxu0  ;;  %v3447_v0 = vadd.f32 %v5437_v62, %v5435_v25  ;;  %v5539_v25 = vld [vmem:[%s5724_s5] ss:$0 sm:$0xff] }
 0x26f   : > { %v5513_v43 = vpop.f32.mrf.mxu0 }
 0x270   : > { %5805 = vst [vmem:[#allocation11_spill] sm:$0xff] %v5513_v43  ;;  %v3484_v52 = vpop.f32.mrf.mxu1 }
 0x271   : > { %v5515_v32 = vpop.f32.mrf.mxu0 }
 0x272   : > { %v3485_v49 = vpop.f32.mrf.mxu1 }
 0x273   : > { %v3486_v27 = vadd.f32 %v3485_v49, %v3484_v52 }
 0x275   : > { %v1935_v21 = vadd.f32 %v3486_v27, %v1790_v17  ;;  %v3889_v40 = vpop.f32.mrf.mxu0 }
 0x276   : > { %v5517_v37 = vpop.f32.mrf.mxu1 }
 0x277   : > { %5806 = vst [vmem:[#allocation7_spill] sm:$0xff] %v5517_v37  ;;  %v5519_v58 = vadd.f32 %v3889_v40, %v1935_v21  ;;  %v5521_v24 = vpop.f32.mrf.mxu0  ;;  %v3450_v40 = vadd.f32 %v5443_v38, %v5439_v29 }
 0x278   : > { %5808 = vst [vmem:[#allocation17_spill] sm:$0xff] %v5521_v24  ;;  %v5523_v42 = vpop.f32.mrf.mxu1 }
 0x279   : > { %5807 = vst [vmem:[#allocation12_spill] sm:$0xff] %v5519_v58  ;;  %5809 = vst [vmem:[#allocation8_spill] sm:$0xff] %v5523_v42  ;;  %v1870_v58 = vadd.f32 %v3447_v0, %v5419_v60  ;;  %v5545_v60 = vld [vmem:[%s5725_s6] ss:$0 sm:$0xff] }
 0x27b   : > { %v3892_v10 = vpop.f32.mrf.mxu0 }
 0x27c   : > { %v3490_v34 = vpop.f32.mrf.mxu1 }
 0x27d   : > { %v5525_v33 = vpop.f32.mrf.mxu0 }
 0x27e   : > { %5810 = vst [vmem:[#allocation13_spill] sm:$0xff] %v5525_v33  ;;  %v3491_v43 = vpop.f32.mrf.mxu1  ;;  %v2015_v33 = vadd.f32 %v2014_v6, %v1870_v58 }
 0x27f   : > { %v3492_v54 = vadd.f32 %v3491_v43, %v3490_v34  ;;  %v3453_v34 = vadd.f32 %v5449_v55, %v5445_v16 }
 0x281   : > { %v1945_v52 = vadd.f32 %v3492_v54, %v1800_v50  ;;  %v3557_v17 = vpop.f32.mrf.mxu0  ;;  %v1875_v50 = vadd.f32 %v3450_v40, %v5421_v23  ;;  %v1880_v43 = vadd.f32 %v3453_v34, %v5423_v48 }
 0x283   : > { %v5529_v49 = vadd.f32 %v3892_v10, %v1945_v52  ;;  %v3558_v27 = vpop.f32.mrf.mxu0  ;;  %v3927_v21 = vpop.f32.mrf.mxu1  ;;  %v2020_v0 = vadd.f32 %v3871_v19, %v1875_v50  ;;  %v2025_v10 = vadd.f32 %v2024_v61, %v1880_v43 }
 0x284   : > { %v3559_v42 = vadd.f32 %v3558_v27, %v3557_v17  ;;  %v3459_v27 = vadd.f32 %v5461_v1, %v5457_v45  ;;  %v3462_v1 = vadd.f32 %v5467_v13, %v5463_v51 }
 0x285   : > { %v3560_v37 = vpop.f32.mrf.mxu0  ;;  %v2516_v24 = vpop.f32.mrf.mxu1 }
 0x286   : > { %v2517_v11 = vadd.f32 %v3559_v42, %v2516_v24  ;;  %v3456_v42 = vadd.f32 %v5455_v2, %v5451_v8 }
 0x287   : > { %v3561_v62 = vpop.f32.mrf.mxu0  ;;  %v3930_v54 = vpop.f32.mrf.mxu1 }
 0x288   : > { %v2595_v29 = vadd.f32 %v2517_v11, %v2015_v33  ;;  %v3562_v38 = vadd.f32 %v3561_v62, %v3560_v37  ;;  %v1885_v40 = vadd.f32 %v3456_v42, %v5425_v26 }
 0x289   : > { %v3563_v6 = vpop.f32.mrf.mxu0  ;;  %v2526_v24 = vpop.f32.mrf.mxu1 }
 0x28a   : > { %v2618_v16 = vmul.f32 %v5539_v25, %v2595_v29  ;;  %v2522_v55 = vadd.f32 %v3927_v21, %v3562_v38  ;;  %v2030_v50 = vadd.f32 %v5485_v63, %v1885_v40 }
 0x28b   : > { %v3564_v58 = vpop.f32.mrf.mxu0  ;;  %v3933_v48 = vpop.f32.mrf.mxu1 }
 0x28c   : > { %v2596_v23 = vadd.f32 %v2522_v55, %v2020_v0  ;;  %v3565_v33 = vadd.f32 %v3564_v58, %v3563_v6  ;;  %v2641_v11 = vadd.f32 %v5545_v60, %v2618_v16  ;;  %v1890_v6 = vadd.f32 %v3459_v27, %v5427_v59 }
 0x28d   : > { %v3566_v37 = vpop.f32.mrf.mxu0  ;;  %v2536_v45 = vpop.f32.mrf.mxu1  ;;  %v3465_v59 = vadd.f32 %v5471_v30, %v5469_v14  ;;  %v3468_v30 = vadd.f32 %v5477_v4, %v5473_v31 }
 0x28e   : > { %v2619_v52 = vmul.f32 %v5539_v25, %v2596_v23  ;;  %v2527_v17 = vadd.f32 %v3565_v33, %v2526_v24  ;;  %v2657_v19 = vmax.f32 %v2641_v11, 0.0  ;;  %v2035_v58 = vadd.f32 %v5495_v7, %v1890_v6 }
 0x28f   : > { %v3567_v21 = vpop.f32.mrf.mxu0  ;;  %v3936_v23 = vpop.f32.mrf.mxu1  ;;  %v1895_v33 = vadd.f32 %v3462_v1, %v5429_v36 }
 0x290   : > { %v2642_v34 = vadd.f32 %v5545_v60, %v2619_v52  ;;  %v2597_v8 = vadd.f32 %v2527_v17, %v2025_v10  ;;  %v3568_v2 = vadd.f32 %v3567_v21, %v3566_v37  ;;  %3981 = vmatprep.mubr.f32.mxu1 %v2657_v19  ;;  %v1900_v19 = vadd.f32 %v3465_v59, %v5431_v9 }
 0x291   : > { %v3569_v62 = vpop.f32.mrf.mxu0  ;;  %v2040_v10 = vadd.f32 %v5491_v5, %v1895_v33  ;;  %v2546_v14 = vpop.f32.mrf.mxu1  ;;  %v3471_v9 = vadd.f32 %v5481_v46, %v5479_v15  ;;  %v3474_v46 = vadd.f32 %v5487_v20, %v5483_v56 }
 0x292   : > { %v2658_v61 = vmax.f32 %v2642_v34, 0.0  ;;  %v2620_v29 = vmul.f32 %v5539_v25, %v2597_v8  ;;  %v2532_v38 = vadd.f32 %v3930_v54, %v3568_v2  ;;  %v2045_v8 = vadd.f32 %v5503_v3, %v1900_v19 }
 0x293   : > { %v3570_v0 = vpop.f32.mrf.mxu0  ;;  %v1910_v1 = vadd.f32 %v3471_v9, %v5441_v53  ;;  %v3477_v53 = vadd.f32 %v5493_v28, %v5489_v57  ;;  %v3480_v28 = vadd.f32 %v5501_v22, %v5497_v47 }
 0x294   : > { %v2598_v26 = vadd.f32 %v2532_v38, %v2030_v50  ;;  %v3571_v16 = vadd.f32 %v3570_v0, %v3569_v62  ;;  %3982 = vmatmul.mubr.f32.vlgmr.msra.gmra.mxu1 %v2658_v61  ;;  %v2643_v55 = vadd.f32 %v5545_v60, %v2620_v29  ;;  %v3939_v50 = vpop.f32.mrf.mxu1  ;;  %v1905_v61 = vadd.f32 %v3468_v30, %v5433_v12  ;;  %v5811_v30 = vld [vmem:[#allocation14_spill] sm:$0xff] }
 0x295   : > { %v3572_v43 = vpop.f32.mrf.mxu0 }
 0x296   : > { %v2537_v63 = vadd.f32 %v3571_v16, %v2536_v45  ;;  %v2659_v24 = vmax.f32 %v2643_v55, 0.0  ;;  %v2621_v42 = vmul.f32 %v5539_v25, %v2598_v26  ;;  %v2050_v6 = vadd.f32 %v5499_v44, %v1905_v61  ;;  %v2556_v15 = vpop.f32.mrf.mxu1  ;;  %v5815_v61 = vld [vmem:[#allocation19_spill] sm:$0xff] }
 0x297   : > { %v3573_v54 = vpop.f32.mrf.mxu0 }
 0x298   : > { %v2599_v51 = vadd.f32 %v2537_v63, %v2035_v58  ;;  %v3574_v13 = vadd.f32 %v3573_v54, %v3572_v43  ;;  %3984 = vmatprep.mubr.f32.mxu1 %v2659_v24  ;;  %v2644_v11 = vadd.f32 %v5545_v60, %v2621_v42  ;;  %v2055_v58 = vadd.f32 %v5511_v41, %v1910_v1  ;;  %v3942_v59 = vpop.f32.mrf.mxu1 }
 0x299   : > { %v3575_v37 = vpop.f32.mrf.mxu0  ;;  %v1915_v54 = vadd.f32 %v3474_v46, %v5447_v39 }
 0x29a   : > { %v2622_v7 = vmul.f32 %v5539_v25, %v2599_v51  ;;  %v2542_v52 = vadd.f32 %v3933_v48, %v3574_v13  ;;  %v2660_v17 = vmax.f32 %v2644_v11, 0.0  ;;  %v2566_v57 = vpop.f32.mrf.mxu1 }
 0x29b   : > { %v3576_v27 = vpop.f32.mrf.mxu0  ;;  %v2060_v51 = vadd.f32 %v5507_v35, %v1915_v54 }
 0x29c   : > { %v2600_v36 = vadd.f32 %v2542_v52, %v2040_v10  ;;  %v3577_v21 = vadd.f32 %v3576_v27, %v3575_v37  ;;  %3985 = vmatmul.mubr.f32.gmra.mxu1 %v2660_v17  ;;  %v2645_v40 = vadd.f32 %v5545_v60, %v2622_v7  ;;  %v1920_v37 = vadd.f32 %v3477_v53, %v5453_v18 }
 0x29d   : > { %v3578_v34 = vpop.f32.mrf.mxu0 }
 0x29e   : > { %v2547_v5 = vadd.f32 %v3577_v21, %v2546_v14  ;;  %v2661_v2 = vmax.f32 %v2645_v40, 0.0  ;;  %v2623_v48 = vmul.f32 %v5539_v25, %v2600_v36  ;;  %v2065_v19 = vadd.f32 %v5515_v32, %v1920_v37  ;;  %v5812_v36 = vld [vmem:[#allocation5_spill] sm:$0xff]  ;;  %v3945_v40 = vpop.f32.mrf.mxu1 }
 0x29f   : > { %v3579_v62 = vpop.f32.mrf.mxu0  ;;  %v3483_v18 = vadd.f32 %v5812_v36, %v5811_v30 }
 0x2a0   : > { %v2601_v31 = vadd.f32 %v2547_v5, %v2045_v8  ;;  %v3580_v4 = vadd.f32 %v3579_v62, %v3578_v34  ;;  %3987 = vmatprep.mubr.f32.mxu1 %v2661_v2  ;;  %v2646_v29 = vadd.f32 %v5545_v60, %v2623_v48  ;;  %v5813_v34 = vld [vmem:[#allocation10_spill] sm:$0xff]  ;;  %v5814_v48 = vld [vmem:[#allocation11_spill] sm:$0xff] }
 0x2a1   : > { %v3581_v38 = vpop.f32.mrf.mxu0  ;;  %v1925_v8 = vadd.f32 %v3480_v28, %v5813_v34 }
 0x2a2   : > { %v2624_v3 = vmul.f32 %v5539_v25, %v2601_v31  ;;  %v2552_v0 = vadd.f32 %v3936_v23, %v3580_v4  ;;  %v2662_v45 = vmax.f32 %v2646_v29, 0.0  ;;  %v1930_v31 = vadd.f32 %v3483_v18, %v5815_v61  ;;  %v2576_v29 = vpop.f32.mrf.mxu1 }
 0x2a3   : > { %v3582_v26 = vpop.f32.mrf.mxu0  ;;  %v2070_v9 = vadd.f32 %v5814_v48, %v1925_v8 }
 0x2a4   : > { %v2602_v12 = vadd.f32 %v2552_v0, %v2050_v6  ;;  %v3583_v16 = vadd.f32 %v3582_v26, %v3581_v38  ;;  %3988 = vmatmul.mubr.f32.gmra.mxu1 %v2662_v45  ;;  %v2647_v55 = vadd.f32 %v5545_v60, %v2624_v3  ;;  %v5816_v0 = vld [vmem:[#allocation17_spill] sm:$0xff]  ;;  %v5817_v26 = vld [vmem:[#allocation7_spill] sm:$0xff] }
 0x2a5   : > { %v3584_v43 = vpop.f32.mrf.mxu0  ;;  %v2075_v45 = vadd.f32 %v5816_v0, %v1930_v31  ;;  %v2885_v31 = vld [vmem:[%s5628_s30 + $0x18] sm:$0xff] }
 0x2a6   : > { %v2557_v44 = vadd.f32 %v3583_v16, %v2556_v15  ;;  %v2663_v63 = vmax.f32 %v2647_v55, 0.0  ;;  %v2625_v24 = vmul.f32 %v5539_v25, %v2602_v12  ;;  %v5818_v15 = vld [vmem:[#allocation8_spill] sm:$0xff] }
 0x2a7   : > { %v3585_v42 = vpop.f32.mrf.mxu0  ;;  %v3489_v46 = vadd.f32 %v5818_v15, %v5817_v26 }
 0x2a8   : > { %v2603_v56 = vadd.f32 %v2557_v44, %v2055_v58  ;;  %v3586_v20 = vadd.f32 %v3585_v42, %v3584_v43  ;;  %3990 = vmatprep.mubr.f32.mxu1 %v2663_v63  ;;  %v2648_v23 = vadd.f32 %v5545_v60, %v2625_v24  ;;  %v3948_v58 = vpop.f32.mrf.mxu1  ;;  %v5819_v42 = vld [vmem:[#allocation6_spill] sm:$0xff] }
 0x2a9   : > { %v3587_v33 = vpop.f32.mrf.mxu0 }
 0x2aa   : > { %v2626_v41 = vmul.f32 %v5539_v25, %v2603_v56  ;;  %v2562_v13 = vadd.f32 %v3939_v50, %v3586_v20  ;;  %v2664_v11 = vmax.f32 %v2648_v23, 0.0 }
 0x2ab   : > { %v3588_v10 = vpop.f32.mrf.mxu0 }
 0x2ac   : > { %v2604_v39 = vadd.f32 %v2562_v13, %v2060_v51  ;;  %v3589_v7 = vadd.f32 %v3588_v10, %v3587_v33  ;;  %3991 = vmatmul.mubr.f32.gmra.mxu1 %v2664_v11  ;;  %v2649_v52 = vadd.f32 %v5545_v60, %v2626_v41  ;;  %v2586_v33 = vpop.f32.mrf.mxu1  ;;  %v5820_v51 = vld [vmem:[#allocation12_spill] sm:$0xff]  ;;  %v5821_v10 = vld [vmem:[#allocation13_spill] sm:$0xff] }
 0x2ad   : > { %v3590_v17 = vpop.f32.mrf.mxu0 }
 0x2ae   : > { %v2567_v35 = vadd.f32 %v3589_v7, %v2566_v57  ;;  %v2665_v27 = vmax.f32 %v2649_v52, 0.0  ;;  %v2627_v14 = vmul.f32 %v5539_v25, %v2604_v39 }
 0x2af   : > { %v3591_v21 = vpop.f32.mrf.mxu0 }
 0x2b0   : > { %v2605_v47 = vadd.f32 %v2567_v35, %v2065_v19  ;;  %v3592_v22 = vadd.f32 %v3591_v21, %v3590_v17  ;;  %3993 = vmatprep.mubr.f32.mxu1 %v2665_v27  ;;  %v2650_v5 = vadd.f32 %v5545_v60, %v2627_v14 }
 0x2b1   : > { %v3593_v2 = vpop.f32.mrf.mxu0 }
 0x2b2   : > { %v2628_v32 = vmul.f32 %v5539_v25, %v2605_v47  ;;  %v2572_v62 = vadd.f32 %v3942_v59, %v3592_v22  ;;  %v2666_v50 = vmax.f32 %v2650_v5, 0.0  ;;  %v1940_v59 = vadd.f32 %v3489_v46, %v5819_v42  ;;  %v2883_v47 = vld [vmem:[%s5628_s30 + $0x8] sm:$0xff]  ;;  %v2882_v22 = vld [vmem:[%s5628_s30] sm:$0xff] }
 0x2b3   : > { %v3594_v4 = vpop.f32.mrf.mxu0 }
 0x2b4   : > { %v2606_v38 = vadd.f32 %v2572_v62, %v2070_v9  ;;  %v3595_v6 = vadd.f32 %v3594_v4, %v3593_v2  ;;  %3994 = vmatmul.mubr.f32.gmra.mxu1 %v2666_v50  ;;  %v2651_v3 = vadd.f32 %v5545_v60, %v2628_v32  ;;  %v2085_v57 = vadd.f32 %v5821_v10, %v1940_v59 }
 0x2b5   : > { %v3596_v1 = vpop.f32.mrf.mxu0  ;;  %v2899_v2 = vmax.f32 %v2883_v47, 0.0  ;;  %v2898_v62 = vmax.f32 %v2882_v22, 0.0  ;;  %v2892_v47 = vld [vmem:[%s5628_s30 + $0x50] sm:$0xff] }
 0x2b6   : > { %v2577_v12 = vadd.f32 %v3595_v6, %v2576_v29  ;;  %v2667_v16 = vmax.f32 %v2651_v3, 0.0  ;;  %v2629_v55 = vmul.f32 %v5539_v25, %v2606_v38  ;;  %v2884_v38 = vld [vmem:[%s5628_s30 + $0x10] sm:$0xff]  ;;  %v2901_v3 = vmax.f32 %v2885_v31, 0.0 }
 0x2b7   : > { %v3597_v43 = vpop.f32.mrf.mxu0  ;;  %v2900_v26 = vmax.f32 %v2884_v38, 0.0 }
 0x2b8   : > { %v2607_v44 = vadd.f32 %v2577_v12, %v2075_v45  ;;  %v3598_v63 = vadd.f32 %v3597_v43, %v3596_v1  ;;  %3996 = vmatprep.mubr.f32.mxu1 %v2667_v16  ;;  %v2652_v24 = vadd.f32 %v5545_v60, %v2629_v55  ;;  %v2887_v12 = vld [vmem:[%s5628_s30 + $0x28] sm:$0xff]  ;;  %v2886_v43 = vld [vmem:[%s5628_s30 + $0x20] sm:$0xff] }
 0x2b9   : > { %v3599_v53 = vpop.f32.mrf.mxu0  ;;  %v2902_v42 = vmax.f32 %v2886_v43, 0.0 }
 0x2ba   : > { %v2630_v54 = vmul.f32 %v5539_v25, %v2607_v44  ;;  %v2582_v56 = vadd.f32 %v3945_v40, %v3598_v63  ;;  %v2668_v20 = vmax.f32 %v2652_v24, 0.0  ;;  %v2903_v44 = vmax.f32 %v2887_v12, 0.0 }
 0x2bb   : > { %v3600_v23 = vpop.f32.mrf.mxu0 }
 0x2bc   : > { %v2608_v41 = vadd.f32 %v2582_v56, %v5820_v51  ;;  %v3601_v13 = vadd.f32 %v3600_v23, %v3599_v53  ;;  %3997 = vmatmul.mubr.f32.gmra.mxu1 %v2668_v20  ;;  %v2653_v11 = vadd.f32 %v5545_v60, %v2630_v54  ;;  %v2889_v56 = vld [vmem:[%s5628_s30 + $0x38] sm:$0xff] }
 0x2bd   : > { %v3602_v37 = vpop.f32.mrf.mxu0 }
 0x2be   : > { %v2587_v28 = vadd.f32 %v3601_v13, %v2586_v33  ;;  %v2669_v39 = vmax.f32 %v2653_v11, 0.0  ;;  %v2631_v7 = vmul.f32 %v5539_v25, %v2608_v41  ;;  %v2888_v33 = vld [vmem:[%s5628_s30 + $0x30] sm:$0xff]  ;;  %v2905_v41 = vmax.f32 %v2889_v56, 0.0 }
 0x2bf   : > { %v3603_v52 = vpop.f32.mrf.mxu0  ;;  %v2904_v10 = vmax.f32 %v2888_v33, 0.0 }
 0x2c0   : > { %v2609_v17 = vadd.f32 %v2587_v28, %v2085_v57  ;;  %v3604_v19 = vadd.f32 %v3603_v52, %v3602_v37  ;;  %3999 = vmatprep.mubr.f32.mxu1 %v2669_v39  ;;  %v2654_v35 = vadd.f32 %v5545_v60, %v2631_v7  ;;  %v2891_v39 = vld [vmem:[%s5628_s30 + $0x48] sm:$0xff] }
 0x2c2   : > { %v2632_v27 = vmul.f32 %v5539_v25, %v2609_v17  ;;  %v2592_v14 = vadd.f32 %v3948_v58, %v3604_v19  ;;  %v2670_v30 = vmax.f32 %v2654_v35, 0.0  ;;  %v2890_v17 = vld [vmem:[%s5628_s30 + $0x40] sm:$0xff]  ;;  %v2907_v35 = vmax.f32 %v2891_v39, 0.0 }
 0x2c4   : > { %v2610_v36 = vadd.f32 %v2592_v14, %v5529_v49  ;;  %4000 = vmatmul.mubr.f32.gmra.mxu1 %v2670_v30  ;;  %v2655_v18 = vadd.f32 %v5545_v60, %v2632_v27  ;;  %v5633_v49 = vld [vmem:[%s5727_s8] ss:$0 sm:$0xff] }
 0x2c6   : > { %v2671_v21 = vmax.f32 %v2655_v18, 0.0  ;;  %v2633_v40 = vmul.f32 %v5539_v25, %v2610_v36  ;;  %v2906_v36 = vmax.f32 %v2890_v17, 0.0 }
 0x2c8   : > { %4002 = vmatprep.mubr.f32.mxu1 %v2671_v21  ;;  %v2656_v34 = vadd.f32 %v5545_v60, %v2633_v40  ;;  %v5639_v60 = vld [vmem:[%s5728_s9] ss:$0 sm:$0xff]  ;;  %v2893_v40 = vld [vmem:[%s5628_s30 + $0x58] sm:$0xff] }
 0x2c9   : > { %v2909_v22 = vmax.f32 %v2893_v40, 0.0 }
 0x2ca   : > { %v2672_v8 = vmax.f32 %v2656_v34, 0.0 }
 0x2cc   : > { %4003 = vmatmul.mubr.f32.gmra.mxu1 %v2672_v8 }
 0x354   : > { %v3983_v25 = vpop.f32.mrf.mxu1 }
 0x355   : > { %v2842_v5 = vmul.f32 %v3983_v25, %v5633_v49 }
 0x356   : > { %v2755_v48 = vpop.f32.mrf.mxu1 }
 0x357   : > { %v2865_v9 = vadd.f32 %v5639_v60, %v2842_v5  ;;  %v2841_v32 = vmul.f32 %v5633_v49, %v2755_v48 }
 0x359   : > { %v2915_v50 = vadd.f32 %v2899_v2, %v2865_v9  ;;  %v2864_v61 = vadd.f32 %v5639_v60, %v2841_v32  ;;  %v2908_v9 = vmax.f32 %v2892_v47, 0.0 }
 0x35b   : > { %2931 = vst [vmem:[%s4185_s11 + $0x8] sm:$0xff] %v2915_v50  ;;  %v2914_v4 = vadd.f32 %v2898_v62, %v2864_v61  ;;  %v2895_v50 = vld [vmem:[%s5628_s30 + $0x68] sm:$0xff] }
 0x35c   : > { %v3986_v29 = vpop.f32.mrf.mxu1  ;;  %v2911_v38 = vmax.f32 %v2895_v50, 0.0 }
 0x35d   : > { %2930 = vst [vmem:[%s4185_s11] sm:$0xff] %v2914_v4  ;;  %v2844_v6 = vmul.f32 %v3986_v29, %v5633_v49  ;;  %v2894_v4 = vld [vmem:[%s5628_s30 + $0x60] sm:$0xff] }
 0x35e   : > { %v2765_v0 = vpop.f32.mrf.mxu1 }
 0x35f   : > { %v2867_v45 = vadd.f32 %v5639_v60, %v2844_v6  ;;  %v2843_v1 = vmul.f32 %v5633_v49, %v2765_v0 }
 0x361   : > { %v2917_v15 = vadd.f32 %v2901_v3, %v2867_v45  ;;  %v2866_v46 = vadd.f32 %v5639_v60, %v2843_v1  ;;  %v2910_v45 = vmax.f32 %v2894_v4, 0.0 }
 0x363   : > { %2933 = vst [vmem:[%s4185_s11 + $0x18] sm:$0xff] %v2917_v15  ;;  %v2916_v16 = vadd.f32 %v2900_v26, %v2866_v46  ;;  %v2897_v15 = vld [vmem:[%s5628_s30 + $0x78] sm:$0xff] }
 0x364   : > { %v3989_v55 = vpop.f32.mrf.mxu1  ;;  %v2913_v43 = vmax.f32 %v2897_v15, 0.0 }
 0x365   : > { %2932 = vst [vmem:[%s4185_s11 + $0x10] sm:$0xff] %v2916_v16  ;;  %v2846_v58 = vmul.f32 %v3989_v55, %v5633_v49  ;;  %v2896_v16 = vld [vmem:[%s5628_s30 + $0x70] sm:$0xff] }
 0x366   : > { %v2775_v63 = vpop.f32.mrf.mxu1 }
 0x367   : > { %v2869_v24 = vadd.f32 %v5639_v60, %v2846_v58  ;;  %v2845_v53 = vmul.f32 %v5633_v49, %v2775_v63 }
 0x369   : > { %v2919_v59 = vadd.f32 %v2903_v44, %v2869_v24  ;;  %v2868_v54 = vadd.f32 %v5639_v60, %v2845_v53  ;;  %v2912_v24 = vmax.f32 %v2896_v16, 0.0 }
 0x36b   : > { %2935 = vst [vmem:[%s4185_s11 + $0x28] sm:$0xff] %v2919_v59  ;;  %v2918_v20 = vadd.f32 %v2902_v42, %v2868_v54 }
 0x36c   : > { %v3992_v23 = vpop.f32.mrf.mxu1 }
 0x36d   : > { %2934 = vst [vmem:[%s4185_s11 + $0x20] sm:$0xff] %v2918_v20  ;;  %v2848_v51 = vmul.f32 %v3992_v23, %v5633_v49 }
 0x36e   : > { %v2785_v13 = vpop.f32.mrf.mxu1 }
 0x36f   : > { %v2871_v11 = vadd.f32 %v5639_v60, %v2848_v51  ;;  %v2847_v37 = vmul.f32 %v5633_v49, %v2785_v13 }
 0x371   : > { %v2921_v57 = vadd.f32 %v2905_v41, %v2871_v11  ;;  %v2870_v28 = vadd.f32 %v5639_v60, %v2847_v37 }
 0x373   : > { %2937 = vst [vmem:[%s4185_s11 + $0x38] sm:$0xff] %v2921_v57  ;;  %v2920_v7 = vadd.f32 %v2904_v10, %v2870_v28 }
 0x374   : > { %v3995_v52 = vpop.f32.mrf.mxu1 }
 0x375   : > { %2936 = vst [vmem:[%s4185_s11 + $0x30] sm:$0xff] %v2920_v7  ;;  %v2850_v19 = vmul.f32 %v3995_v52, %v5633_v49 }
 0x376   : > { %v2795_v27 = vpop.f32.mrf.mxu1 }
 0x377   : > { %v2873_v14 = vadd.f32 %v5639_v60, %v2850_v19  ;;  %v2849_v30 = vmul.f32 %v5633_v49, %v2795_v27 }
 0x379   : > { %v2923_v18 = vadd.f32 %v2907_v35, %v2873_v14  ;;  %v2872_v21 = vadd.f32 %v5639_v60, %v2849_v30 }
 0x37b   : > { %2939 = vst [vmem:[%s4185_s11 + $0x48] sm:$0xff] %v2923_v18  ;;  %v2922_v34 = vadd.f32 %v2906_v36, %v2872_v21 }
 0x37c   : > { %v3998_v8 = vpop.f32.mrf.mxu1 }
 0x37d   : > { %2938 = vst [vmem:[%s4185_s11 + $0x40] sm:$0xff] %v2922_v34  ;;  %v2852_v25 = vmul.f32 %v3998_v8, %v5633_v49 }
 0x37e   : > { %v2805_v5 = vpop.f32.mrf.mxu1 }
 0x37f   : > { %v2875_v2 = vadd.f32 %v5639_v60, %v2852_v25  ;;  %v2851_v48 = vmul.f32 %v5633_v49, %v2805_v5 }
 0x381   : > { %v2925_v32 = vadd.f32 %v2909_v22, %v2875_v2  ;;  %v2874_v62 = vadd.f32 %v5639_v60, %v2851_v48 }
 0x383   : > { %2941 = vst [vmem:[%s4185_s11 + $0x58] sm:$0xff] %v2925_v32  ;;  %v2924_v61 = vadd.f32 %v2908_v9, %v2874_v62 }
 0x384   : > { %v4001_v31 = vpop.f32.mrf.mxu1 }
 0x385   : > { %2940 = vst [vmem:[%s4185_s11 + $0x50] sm:$0xff] %v2924_v61  ;;  %v2854_v29 = vmul.f32 %v4001_v31, %v5633_v49 }
 0x386   : > { %v2815_v6 = vpop.f32.mrf.mxu1 }
 0x387   : > { %v2877_v3 = vadd.f32 %v5639_v60, %v2854_v29  ;;  %v2853_v0 = vmul.f32 %v5633_v49, %v2815_v6 }
 0x389   : > { %v2927_v1 = vadd.f32 %v2911_v38, %v2877_v3  ;;  %v2876_v26 = vadd.f32 %v5639_v60, %v2853_v0 }
 0x38b   : > { %2943 = vst [vmem:[%s4185_s11 + $0x68] sm:$0xff] %v2927_v1  ;;  %v2926_v46 = vadd.f32 %v2910_v45, %v2876_v26 }
 0x38c   : > { %v4004_v12 = vpop.f32.mrf.mxu1 }
 0x38d   : > { %2942 = vst [vmem:[%s4185_s11 + $0x60] sm:$0xff] %v2926_v46  ;;  %v2856_v55 = vmul.f32 %v4004_v12, %v5633_v49 }
 0x38e   : > { %v2825_v58 = vpop.f32.mrf.mxu1 }
 0x38f   : > { %v2879_v44 = vadd.f32 %v5639_v60, %v2856_v55  ;;  %v2855_v63 = vmul.f32 %v5633_v49, %v2825_v58 }
 0x391   : > { %v2929_v53 = vadd.f32 %v2913_v43, %v2879_v44  ;;  %v2878_v42 = vadd.f32 %v5639_v60, %v2855_v63 }
 0x393   : > { %2945 = vst [vmem:[%s4185_s11 + $0x78] sm:$0xff] %v2929_v53  ;;  %v2928_v59 = vadd.f32 %v2912_v24, %v2878_v42 }
 0x395   : > { %2944 = vst [vmem:[%s4185_s11 + $0x70] sm:$0xff] %v2928_v59 }
 0x396 PF: > { %s20_s17 = sadd.s32 1, %s4086_s17   ;;  %s5822_s25 = sld [smem:[#allocation3_spill]] }
 0x397   : > { %p17_p8 = scmp.ge.s32.totalorder %s20_s17, 6   ;;  %s5823_s12 = sld [smem:[#allocation4_spill]] }
 0x398   : > { %s5824_s13 = smov %s4078_s15  ;;  %s5825_s14 = smov %s4082_s16 }
 0x399   :  { %19 = sbr.rel (!%p17_p8) target bundleno = 3 (0x3), region = 104 }
 0x39c   : > { %s5826_s15 = smov %s5822_s25 }
 0x39d   : > { %s5827_s16 = smov %s5823_s12 }

</bundles_post_ra>
